<compile_context>
chip_gen: v7x
topology: tpu7x:2x2x1
jax: 0.10.0
libtpu: 0.0.40
codegen_flags: <defaults>
</compile_context>

<pallas_src>
import functools
import math

import jax
import jax.numpy as jnp
from jax.experimental import pallas as pl
from jax.experimental.pallas import tpu as pltpu


def _round_up(x, m):
    return ((x + m - 1) // m) * m


# ----------------------------------------------------------------------------
# Fused kernel: one stacked conv matmul + shifted adds + ReLU + max-pool + FC
# ----------------------------------------------------------------------------

def _make_cnn_kernel(kernel_sizes, seq_len, s_pad, tb, c_pad, n_stack):
    prefix = []
    p = 0
    for k in kernel_sizes:
        prefix.append(p)
        p += k

    def kernel(x_ref, w_ref, b_ref, fcw_ref, fcb_ref, out_ref):
        # x_ref  : (tb*s_pad, e_pad)  bf16  -- TB batch rows, time-flattened
        # w_ref  : (e_pad, n_stack)   bf16  -- every branch/offset stacked on N
        # b_ref  : (1, nk*c_pad)      f32   -- conv biases (padded chans = 0)
        # fcw_ref: (nk*c_pad, o_pad)  f32
        # fcb_ref: (1, o_pad)         f32
        # out_ref: (tb, o_pad)        f32
        x = x_ref[...]
        # One wide MXU matmul covering every conv branch and tap offset.
        y = jnp.dot(x, w_ref[...], preferred_element_type=jnp.float32)
        y = y.reshape(tb, s_pad, n_stack)   # free: s_pad % 8 == 0, n_stack % 128 == 0
        b_all = b_ref[...]

        feats = []
        for bi, k in enumerate(kernel_sizes):
            t_out = seq_len - k + 1         # only valid (unpadded) time steps
            base = prefix[bi]
            # k-1 shifted adds on the matmul OUTPUT; channel slabs are
            # 128-lane aligned so only the time offset needs a relayout.
            acc = y[:, 0:t_out, base * c_pad:(base + 1) * c_pad]
            for i in range(1, k):
                acc = acc + y[:, i:i + t_out,
                              (base + i) * c_pad:(base + i + 1) * c_pad]
            bias = b_all[:, bi * c_pad:(bi + 1) * c_pad]        # (1, c_pad)
            acc = jnp.maximum(acc + bias[:, None, :], 0.0)      # bias + ReLU
            feats.append(jnp.max(acc, axis=1))                  # (tb, c_pad)
        feat = jnp.concatenate(feats, axis=-1)                  # (tb, nk*c_pad)
        # dropout: eval mode -> identity
        out = jnp.dot(feat, fcw_ref[...],
                      preferred_element_type=jnp.float32) + fcb_ref[...]
        out_ref[...] = out.astype(out_ref.dtype)

    return kernel


# ----------------------------------------------------------------------------
# Forward wrapper
# ----------------------------------------------------------------------------

@functools.partial(jax.jit, static_argnames=("kernel_sizes", "class_num"))
def cnn_w2v_forward(text, params, *, kernel_sizes, class_num):
    """text: (batch, seq) int32 -> {'output': (batch, class_num)} f32."""
    B, S = text.shape
    assert S >= max(kernel_sizes), "seq_len must be >= max(kernel_sizes)"

    emb = params["embedding"]          # (V, E_pad)         bf16
    w_all = params["conv_w_all"]       # (E_pad, n_stack)   bf16
    b_all = params["conv_b_all"]       # (1, nk*C_pad)      f32
    fc_w = params["fc_w"]              # (nk*C_pad, O_pad)  f32
    fc_b = params["fc_b"]              # (1, O_pad)         f32
    e_pad = emb.shape[1]
    nk = len(kernel_sizes)
    c_pad = b_all.shape[1] // nk
    n_stack = w_all.shape[1]
    o_pad = fc_b.shape[1]

    # TODO(synk): the embedding gather stays in XLA glue; fusing it would need
    # scalar-prefetched token ids + per-row manual DMA gather (many tiny DMAs),
    # not worth it at these sizes.
    x = emb[text]                      # (B, S, E_pad) bf16 gather

    # Layout padding: S -> multiple of 8 (sublanes), batch -> multiple of TB.
    s_pad = _round_up(S, 8)
    tb = max(8, _round_up((512 + s_pad - 1) // s_pad, 8))   # target M = TB*S ~ 512
    tb = min(tb, _round_up(B, 8))
    b_pad = _round_up(B, tb)
    if (b_pad - B) or (s_pad - S):
        x = jnp.pad(x, ((0, b_pad - B), (0, s_pad - S), (0, 0)))
    x2d = x.reshape(b_pad * s_pad, e_pad)

    kernel = _make_cnn_kernel(tuple(kernel_sizes), S, s_pad, tb, c_pad, n_stack)

    # Rough per-step VMEM budget (double-buffered blocks + f32 matmul output);
    # clamp to [32 MiB, 64 MiB] so it is valid on v5e/v6e (128 MiB) and v7x (64 MiB).
    est = 2 * (tb * s_pad * e_pad * 2 + e_pad * n_stack * 2
               + fc_w.size * 4 + b_all.size * 4 + fc_b.size * 4
               + tb * o_pad * 4) + 2 * (tb * s_pad * n_stack * 4)
    vmem_limit = int(min(max(est + (4 << 20), 32 << 20), 64 << 20))

    out = pl.pallas_call(
        kernel,
        out_shape=jax.ShapeDtypeStruct((b_pad, o_pad), jnp.float32),
        grid_spec=pltpu.PrefetchScalarGridSpec(
            num_scalar_prefetch=0,
            grid=(b_pad // tb,),
            in_specs=[
                pl.BlockSpec((tb * s_pad, e_pad), lambda g: (g, 0)),
                pl.BlockSpec(w_all.shape, lambda g: (0, 0)),
                pl.BlockSpec(b_all.shape, lambda g: (0, 0)),
                pl.BlockSpec(fc_w.shape, lambda g: (0, 0)),
                pl.BlockSpec(fc_b.shape, lambda g: (0, 0)),
            ],
            out_specs=pl.BlockSpec((tb, o_pad), lambda g: (g, 0)),
        ),
        compiler_params=pltpu.CompilerParams(
            dimension_semantics=("parallel",),
            vmem_limit_bytes=vmem_limit,
        ),
    )(x2d, w_all, b_all, fc_w, fc_b)

    return {"output": out[:B, :class_num]}


# ----------------------------------------------------------------------------
# Parameter construction (shapes match nn.Embedding / nn.Conv2d / nn.Linear),
# pre-padded / pre-stacked into the kernel's lane-dense layout.
# ----------------------------------------------------------------------------

def init_params(key, vocab_size, embed_dim, class_num, kernel_num, kernel_sizes):
    nk = len(kernel_sizes)
    e_pad = _round_up(embed_dim, 128)
    c_pad = _round_up(kernel_num, 128)
    o_pad = _round_up(class_num, 128)
    n_stack = sum(kernel_sizes) * c_pad
    prefix = []
    p = 0
    for k in kernel_sizes:
        prefix.append(p)
        p += k

    params = {}

    # Stands in for the pretrained w2v `weight` copied into nn.Embedding.
    key, k_emb = jax.random.split(key)
    emb = jax.random.normal(k_emb, (vocab_size, embed_dim), jnp.float32) * 0.1
    emb_pad = jnp.zeros((vocab_size, e_pad), jnp.float32).at[:, :embed_dim].set(emb)
    params["embedding"] = emb_pad.astype(jnp.bfloat16)

    # Conv2d(in=1, out=C, (k, E)) weights, stacked along N per (branch, offset).
    w_all = jnp.zeros((e_pad, n_stack), jnp.float32)
    b_all = jnp.zeros((1, nk * c_pad), jnp.float32)
    for bi, ks in enumerate(kernel_sizes):
        key, kw, kb = jax.random.split(key, 3)
        fan_in = 1 * ks * embed_dim
        bound = 1.0 / math.sqrt(fan_in)
        w = jax.random.uniform(kw, (kernel_num, 1, ks, embed_dim), jnp.float32,
                               -bound, bound)
        b = jax.random.uniform(kb, (kernel_num,), jnp.float32, -bound, bound)
        for i in range(ks):
            col0 = (prefix[bi] + i) * c_pad
            # W_all[e, col0 + c] = W[c, 0, i, e]
            w_all = w_all.at[:embed_dim, col0:col0 + kernel_num].set(w[:, 0, i, :].T)
        b_all = b_all.at[0, bi * c_pad:bi * c_pad + kernel_num].set(b)
    params["conv_w_all"] = w_all.astype(jnp.bfloat16)
    params["conv_b_all"] = b_all

    # Linear(nk*C, class_num), rows laid out to match the padded concat.
    key, kw, kb = jax.random.split(key, 3)
    fc_in = nk * kernel_num
    bound = 1.0 / math.sqrt(fc_in)
    w_fc = jax.random.uniform(kw, (class_num, fc_in), jnp.float32, -bound, bound)
    b_fc = jax.random.uniform(kb, (class_num,), jnp.float32, -bound, bound)
    fc_w_pad = jnp.zeros((nk * c_pad, o_pad), jnp.float32)
    for bi in range(nk):
        fc_w_pad = fc_w_pad.at[bi * c_pad:bi * c_pad + kernel_num, :class_num].set(
            w_fc[:, bi * kernel_num:(bi + 1) * kernel_num].T)
    params["fc_w"] = fc_w_pad
    params["fc_b"] = jnp.zeros((1, o_pad), jnp.float32).at[0, :class_num].set(b_fc)
    return params


# ----------------------------------------------------------------------------
# Pure-JAX reference (same padded params) for a numerical sanity check.
# ----------------------------------------------------------------------------

def _reference_forward(text, params, kernel_sizes, class_num):
    emb = params["embedding"].astype(jnp.float32)
    x = emb[text]                                   # (B, S, E_pad)
    nk = len(kernel_sizes)
    c_pad = params["conv_b_all"].shape[1] // nk
    w_all = params["conv_w_all"].astype(jnp.float32)
    feats = []
    prefix = 0
    for bi, k in enumerate(kernel_sizes):
        t_out = x.shape[1] - k + 1
        acc = jnp.zeros((x.shape[0], t_out, c_pad), jnp.float32)
        for i in range(k):
            w_i = w_all[:, (prefix + i) * c_pad:(prefix + i + 1) * c_pad]
            acc = acc + jnp.einsum("bte,ec->btc", x[:, i:i + t_out, :], w_i)
        prefix += k
        bias = params["conv_b_all"][0, bi * c_pad:(bi + 1) * c_pad]
        acc = jnp.maximum(acc + bias[None, None, :], 0.0)
        feats.append(jnp.max(acc, axis=1))
    feat = jnp.concatenate(feats, axis=-1)
    out = feat @ params["fc_w"] + params["fc_b"]
    return out[:, :class_num]


if __name__ == "__main__":
    vocab_size = 50
    embed_dim = 16
    class_num = 4
    kernel_num = 8
    kernel_sizes = (3, 4, 5)
    batch = 2
    seq = 8

    key = jax.random.PRNGKey(0)
    k_text, k_params = jax.random.split(key)
    text = jax.random.randint(k_text, (batch, seq), 0, vocab_size, jnp.int32)
    params = init_params(k_params, vocab_size, embed_dim, class_num,
                         kernel_num, kernel_sizes)

    result = cnn_w2v_forward(text, params, kernel_sizes=kernel_sizes,
                             class_num=class_num)
    out = jax.block_until_ready(result["output"])
    assert out.shape == (batch, class_num)
    assert jnp.all(jnp.isfinite(out))

    ref = _reference_forward(text, params, kernel_sizes, class_num)
    assert jnp.allclose(out, ref, atol=2e-2, rtol=2e-2), (out, ref)

    print("KERNEL_OK")
</pallas_src>

<mosaic_0001>
module attributes {stable_mosaic.version = 11 : i64} {
  func.func @kernel(%arg0: i32, %arg1: memref<64x128xbf16, #tpu.memory_space<vmem>>, %arg2: memref<128x1536xbf16, #tpu.memory_space<vmem>>, %arg3: memref<1x384xf32, #tpu.memory_space<vmem>>, %arg4: memref<384x128xf32, #tpu.memory_space<vmem>>, %arg5: memref<1x128xf32, #tpu.memory_space<vmem>>, %arg6: memref<8x128xf32, #tpu.memory_space<vmem>>) attributes {dimension_semantics = [#tpu.dimension_semantics<parallel>], iteration_bounds = array<i64: 1>, scalar_prefetch = 0 : i64, scratch_operands = 0 : i64, tpu.core_type = #tpu.core_type<tc>, window_params = [{transform_indices = @transform_0, window_bounds = array<i64: 64, 128>}, {pipeline_mode = #tpu.pipeline_mode<synchronous>, transform_indices = @transform_1, window_bounds = array<i64: 128, 1536>}, {pipeline_mode = #tpu.pipeline_mode<synchronous>, transform_indices = @transform_2, window_bounds = array<i64: 1, 384>}, {pipeline_mode = #tpu.pipeline_mode<synchronous>, transform_indices = @transform_3, window_bounds = array<i64: 384, 128>}, {pipeline_mode = #tpu.pipeline_mode<synchronous>, transform_indices = @transform_4, window_bounds = array<i64: 1, 128>}, {transform_indices = @transform_5, window_bounds = array<i64: 8, 128>}]} {
    %c0 = arith.constant 0 : index
    %c0_0 = arith.constant 0 : index
    %0 = vector.load %arg1[%c0, %c0_0] : memref<64x128xbf16, #tpu.memory_space<vmem>>, vector<64x128xbf16>
    %c0_1 = arith.constant 0 : index
    %c0_2 = arith.constant 0 : index
    %1 = vector.load %arg2[%c0_1, %c0_2] : memref<128x1536xbf16, #tpu.memory_space<vmem>>, vector<128x1536xbf16>
    %cst = arith.constant dense<0.000000e+00> : vector<64x1536xf32>
    %2 = tpu.matmul %0, %1, %cst {dimension_numbers = #tpu.dot_dimension_numbers<[1], [0], [0], [1], [0, 0, 1, 1], [], []>} : vector<64x128xbf16>, vector<128x1536xbf16>, vector<64x1536xf32> -> vector<64x1536xf32>
    %3 = vector.shape_cast %2 : vector<64x1536xf32> to vector<8x8x1536xf32>
    %c0_3 = arith.constant 0 : index
    %c0_4 = arith.constant 0 : index
    %4 = vector.load %arg3[%c0_3, %c0_4] : memref<1x384xf32, #tpu.memory_space<vmem>>, vector<1x384xf32>
    %5 = vector.extract_strided_slice %3 {offsets = [0, 0, 0], sizes = [8, 6, 128], strides = [1, 1, 1]} : vector<8x8x1536xf32> to vector<8x6x128xf32>
    %6 = vector.extract_strided_slice %3 {offsets = [0, 1, 128], sizes = [8, 6, 128], strides = [1, 1, 1]} : vector<8x8x1536xf32> to vector<8x6x128xf32>
    %7 = arith.addf %5, %6 : vector<8x6x128xf32>
    %8 = vector.extract_strided_slice %3 {offsets = [0, 2, 256], sizes = [8, 6, 128], strides = [1, 1, 1]} : vector<8x8x1536xf32> to vector<8x6x128xf32>
    %9 = arith.addf %7, %8 : vector<8x6x128xf32>
    %10 = vector.extract_strided_slice %4 {offsets = [0, 0], sizes = [1, 128], strides = [1, 1]} : vector<1x384xf32> to vector<1x128xf32>
    %11 = vector.shape_cast %10 : vector<1x128xf32> to vector<1x1x128xf32>
    %12 = vector.broadcast %11 : vector<1x1x128xf32> to vector<8x6x128xf32>
    %13 = arith.addf %9, %12 : vector<8x6x128xf32>
    %cst_5 = arith.constant 0.000000e+00 : f32
    %14 = vector.broadcast %cst_5 : f32 to vector<8x6x128xf32>
    %15 = arith.maximumf %13, %14 : vector<8x6x128xf32>
    %cst_6 = arith.constant dense<0xFF800000> : vector<8x128xf32>
    %16 = vector.multi_reduction <maximumf>, %15, %cst_6 [1] : vector<8x6x128xf32> to vector<8x128xf32>
    %17 = vector.extract_strided_slice %3 {offsets = [0, 0, 384], sizes = [8, 5, 128], strides = [1, 1, 1]} : vector<8x8x1536xf32> to vector<8x5x128xf32>
    %18 = vector.extract_strided_slice %3 {offsets = [0, 1, 512], sizes = [8, 5, 128], strides = [1, 1, 1]} : vector<8x8x1536xf32> to vector<8x5x128xf32>
    %19 = arith.addf %17, %18 : vector<8x5x128xf32>
    %20 = vector.extract_strided_slice %3 {offsets = [0, 2, 640], sizes = [8, 5, 128], strides = [1, 1, 1]} : vector<8x8x1536xf32> to vector<8x5x128xf32>
    %21 = arith.addf %19, %20 : vector<8x5x128xf32>
    %22 = vector.extract_strided_slice %3 {offsets = [0, 3, 768], sizes = [8, 5, 128], strides = [1, 1, 1]} : vector<8x8x1536xf32> to vector<8x5x128xf32>
    %23 = arith.addf %21, %22 : vector<8x5x128xf32>
    %24 = vector.extract_strided_slice %4 {offsets = [0, 128], sizes = [1, 128], strides = [1, 1]} : vector<1x384xf32> to vector<1x128xf32>
    %25 = vector.shape_cast %24 : vector<1x128xf32> to vector<1x1x128xf32>
    %26 = vector.broadcast %25 : vector<1x1x128xf32> to vector<8x5x128xf32>
    %27 = arith.addf %23, %26 : vector<8x5x128xf32>
    %cst_7 = arith.constant 0.000000e+00 : f32
    %28 = vector.broadcast %cst_7 : f32 to vector<8x5x128xf32>
    %29 = arith.maximumf %27, %28 : vector<8x5x128xf32>
    %cst_8 = arith.constant dense<0xFF800000> : vector<8x128xf32>
    %30 = vector.multi_reduction <maximumf>, %29, %cst_8 [1] : vector<8x5x128xf32> to vector<8x128xf32>
    %31 = vector.extract_strided_slice %3 {offsets = [0, 0, 896], sizes = [8, 4, 128], strides = [1, 1, 1]} : vector<8x8x1536xf32> to vector<8x4x128xf32>
    %32 = vector.extract_strided_slice %3 {offsets = [0, 1, 1024], sizes = [8, 4, 128], strides = [1, 1, 1]} : vector<8x8x1536xf32> to vector<8x4x128xf32>
    %33 = arith.addf %31, %32 : vector<8x4x128xf32>
    %34 = vector.extract_strided_slice %3 {offsets = [0, 2, 1152], sizes = [8, 4, 128], strides = [1, 1, 1]} : vector<8x8x1536xf32> to vector<8x4x128xf32>
    %35 = arith.addf %33, %34 : vector<8x4x128xf32>
    %36 = vector.extract_strided_slice %3 {offsets = [0, 3, 1280], sizes = [8, 4, 128], strides = [1, 1, 1]} : vector<8x8x1536xf32> to vector<8x4x128xf32>
    %37 = arith.addf %35, %36 : vector<8x4x128xf32>
    %38 = vector.extract_strided_slice %3 {offsets = [0, 4, 1408], sizes = [8, 4, 128], strides = [1, 1, 1]} : vector<8x8x1536xf32> to vector<8x4x128xf32>
    %39 = arith.addf %37, %38 : vector<8x4x128xf32>
    %40 = vector.extract_strided_slice %4 {offsets = [0, 256], sizes = [1, 128], strides = [1, 1]} : vector<1x384xf32> to vector<1x128xf32>
    %41 = vector.shape_cast %40 : vector<1x128xf32> to vector<1x1x128xf32>
    %42 = vector.broadcast %41 : vector<1x1x128xf32> to vector<8x4x128xf32>
    %43 = arith.addf %39, %42 : vector<8x4x128xf32>
    %cst_9 = arith.constant 0.000000e+00 : f32
    %44 = vector.broadcast %cst_9 : f32 to vector<8x4x128xf32>
    %45 = arith.maximumf %43, %44 : vector<8x4x128xf32>
    %cst_10 = arith.constant dense<0xFF800000> : vector<8x128xf32>
    %46 = vector.multi_reduction <maximumf>, %45, %cst_10 [1] : vector<8x4x128xf32> to vector<8x128xf32>
    %47 = tpu.concatenate %16, %30, %46 in 1 : vector<8x128xf32>, vector<8x128xf32>, vector<8x128xf32> -> vector<8x384xf32>
    %c0_11 = arith.constant 0 : index
    %c0_12 = arith.constant 0 : index
    %48 = vector.load %arg4[%c0_11, %c0_12] : memref<384x128xf32, #tpu.memory_space<vmem>>, vector<384x128xf32>
    %cst_13 = arith.constant dense<0.000000e+00> : vector<8x128xf32>
    %49 = tpu.matmul %47, %48, %cst_13 {dimension_numbers = #tpu.dot_dimension_numbers<[1], [0], [0], [1], [0, 0, 1, 1], [], []>} : vector<8x384xf32>, vector<384x128xf32>, vector<8x128xf32> -> vector<8x128xf32>
    %c0_14 = arith.constant 0 : index
    %c0_15 = arith.constant 0 : index
    %50 = vector.load %arg5[%c0_14, %c0_15] : memref<1x128xf32, #tpu.memory_space<vmem>>, vector<1x128xf32>
    %51 = vector.broadcast %50 : vector<1x128xf32> to vector<8x128xf32>
    %52 = arith.addf %49, %51 : vector<8x128xf32>
    %c0_16 = arith.constant 0 : index
    %c0_17 = arith.constant 0 : index
    %53 = vector.load %arg6[%c0_16, %c0_17] : memref<8x128xf32, #tpu.memory_space<vmem>>, vector<8x128xf32>
    tpu.vector_store %arg6[%c0_16, %c0_17], %52 {strides = array<i32>} : memref<8x128xf32, #tpu.memory_space<vmem>>, vector<8x128xf32>,
    return
  }
  func.func @transform_0(%arg0: i32) -> (i32, i32) {
    %c0_i32 = arith.constant 0 : i32
    %c0_i32_0 = arith.constant 0 : i32
    return %arg0, %c0_i32 : i32, i32
  }
  func.func @transform_1(%arg0: i32) -> (i32, i32) {
    %c0_i32 = arith.constant 0 : i32
    %c0_i32_0 = arith.constant 0 : i32
    %c0_i32_1 = arith.constant 0 : i32
    return %c0_i32, %c0_i32_0 : i32, i32
  }
  func.func @transform_2(%arg0: i32) -> (i32, i32) {
    %c0_i32 = arith.constant 0 : i32
    %c0_i32_0 = arith.constant 0 : i32
    %c0_i32_1 = arith.constant 0 : i32
    return %c0_i32, %c0_i32_0 : i32, i32
  }
  func.func @transform_3(%arg0: i32) -> (i32, i32) {
    %c0_i32 = arith.constant 0 : i32
    %c0_i32_0 = arith.constant 0 : i32
    %c0_i32_1 = arith.constant 0 : i32
    return %c0_i32, %c0_i32_0 : i32, i32
  }
  func.func @transform_4(%arg0: i32) -> (i32, i32) {
    %c0_i32 = arith.constant 0 : i32
    %c0_i32_0 = arith.constant 0 : i32
    %c0_i32_1 = arith.constant 0 : i32
    return %c0_i32, %c0_i32_0 : i32, i32
  }
  func.func @transform_5(%arg0: i32) -> (i32, i32) {
    %c0_i32 = arith.constant 0 : i32
    %c0_i32_0 = arith.constant 0 : i32
    return %arg0, %c0_i32 : i32, i32
  }
}

</mosaic_0001>

<bundles_post_ra>
// kernel: cnn_w2v_forward.1
= control target key start
LH: loop header
LB: loop body
LE: loop exit
PB: predicated region body
PF: predicated region fallthrough
CT: control target
= control target key end

     0   :  { %10 = vsyncpa [#allocation3], 0  ;;  %s2620_s0 = inlined_call_operand.vmem [shape: bf16[64,128], index: 0, kind: input, shape index: {}]   ;;  %s2621_s1 = inlined_call_operand.hbm [shape: bf16[128,1536], index: 1, kind: input, shape index: {}]   ;;  %s2622_s2 = inlined_call_operand.vmem [shape: f32[1,384], index: 2, kind: input, shape index: {}]   ;;  %s2623_s3 = inlined_call_operand.hbm [shape: f32[384,128], index: 3, kind: input, shape index: {}]   ;;  %s2624_s4 = inlined_call_operand.vmem [shape: f32[1,128], index: 4, kind: input, shape index: {}]   ;;  %s2625_s5 = inlined_call_operand.vmem [shape: f32[8,128], index: 5, kind: output, shape index: {}]  }
   0x1   :  { %11 = vsyncpa [#allocation5], 0  ;;  %s2328_s18 = smov [#allocation2]   ;;  %s2280_s22 = scalar_lea.hbm %s2621_s1, 12288 }
   0x2   :  { %s19_s19 = sshll.u32 %s2328_s18, 4  ;;  %p2281_p0 = scmp.ne.s32.totalorder %s2621_s1, %s2280_s22  ;;  %s20_s19 = int_to_ptr.vmem [resolvable:$true] %s19_s19 }
   0x3   :  { %p2284_p1 = scmp.lt.u32.totalorder %s2280_s22, %s2621_s1 }
   0x5   :  { %p2286_p2 = pnand %p2284_p1, %p2281_p0 }
   0x7   :  { %2289 = shalt.err (!%p2286_p2)
}
   0x8   :  { %s2290_s27 = scalar_lea.vmem %s20_s19, 12288  ;;  %p2295_p4 = scmp.lt.s32.totalorder %s20_s19, %s20_s19 }
   0x9   :  { %p2291_p3 = scmp.ne.s32.totalorder %s20_s19, %s2290_s27  ;;  %p2296_p5 = scmp.lt.s32.totalorder %s2290_s27, %s2290_s27 }
   0xb   :  { %p2297_p6 = por %p2296_p5, %p2295_p4 }
   0xd   :  { %p2298_p7 = pnand %p2297_p6, %p2291_p3 }
   0xf   :  { %2301 = shalt.err (!%p2298_p7)
}
  0x10   :  { %s2329_s28 = smov 768   ;;  %s2330_s29 = smov 48  }
  0x11   :  { %25 = dma.hbm_to_vmem [thread:$0]  %s2621_s1, 12288, %s20_s19, [#allocation3], %s2329_s28, %s2329_s28, %s2330_s29  }
  0x12   :  { %s2331_s7 = smov [#allocation4]   ;;  %s2302_s11 = scalar_lea.hbm %s2623_s3, 6144 }
  0x13   :  { %s33_s8 = sshll.u32 %s2331_s7, 4  ;;  %p2303_p8 = scmp.ne.s32.totalorder %s2623_s3, %s2302_s11  ;;  %s34_s8 = int_to_ptr.vmem [resolvable:$true] %s33_s8 }
  0x14   :  { %p2306_p9 = scmp.lt.u32.totalorder %s2302_s11, %s2623_s3 }
  0x16   :  { %p2308_p10 = pnand %p2306_p9, %p2303_p8 }
  0x18   :  { %2311 = shalt.err (!%p2308_p10)
}
  0x19   :  { %s2312_s16 = scalar_lea.vmem %s34_s8, 6144  ;;  %p2317_p12 = scmp.lt.s32.totalorder %s34_s8, %s34_s8 }
  0x1a   :  { %p2313_p11 = scmp.ne.s32.totalorder %s34_s8, %s2312_s16  ;;  %p2318_p13 = scmp.lt.s32.totalorder %s2312_s16, %s2312_s16 }
  0x1c   :  { %p2319_p0 = por %p2318_p13, %p2317_p12 }
  0x1e   :  { %p2320_p1 = pnand %p2319_p0, %p2313_p11 }
  0x20   :  { %2323 = shalt.err (!%p2320_p1)
}
  0x21   :  { %s2332_s1 = smov 128   ;;  %s2333_s17 = smov 8  }
  0x22   :  { %39 = dma.hbm_to_vmem [thread:$0]  %s2623_s3, 6144, %s34_s8, [#allocation5], %s2332_s1, %s2332_s1, %s2333_s17  }
  0x23   :  { %2324 = dma.done.wait [#allocation3], 12288  }
  0x24   :  { %2325 = vsyncadd [#allocation3], 4294955008 }
  0x25   :  { %2326 = dma.done.wait [#allocation5], 6144  }
  0x26   :  { %2327 = vsyncadd [#allocation5], 4294961152  ;;  %v2334_v0 = vmov 0   ;;  %v2132_v1 = vld [vmem:[#allocation2 + $0x4] ss:$48 sps:$4 sm:$0xff]   ;;  %v2406_v43 = vld [vmem:[%s2620_s0 + $0x8] sm:$0xff]  }
  0x27   :  { %689 = vmatprep.mubr.bf16.mxu0 %v2334_v0  ;;  %762 = vmatprep.mubr.bf16.mxu1 %v2334_v0  ;;  %v2134_v2 = vld [vmem:[#allocation2] ss:$48 sps:$4 sm:$0xff]   ;;  %v2135_v3 = vld [vmem:[#allocation2 + $0xc] ss:$48 sps:$4 sm:$0xff]   ;;  %v2137_v4 = vld [vmem:[#allocation2 + $0x8] ss:$48 sps:$4 sm:$0xff]  }
  0x28   :  { %657 = vmatprep.subr.bf16.mxu0 %v2132_v1  ;;  %v2138_v5 = vld [vmem:[#allocation2 + $0x64] ss:$48 sps:$4 sm:$0xff]   ;;  %v2140_v6 = vld [vmem:[#allocation2 + $0x60] ss:$48 sps:$4 sm:$0xff]   ;;  %730 = vmatprep.subr.bf16.mxu1 %v2135_v3  ;;  %v2141_v7 = vld [vmem:[#allocation2 + $0x6c] ss:$48 sps:$4 sm:$0xff]  }
  0x29   :  { %658 = vmatpush1.bf16.msra.mxu0 %v2134_v2  ;;  %731 = vmatpush1.bf16.msra.mxu1 %v2137_v4  ;;  %v2143_v8 = vld [vmem:[#allocation2 + $0x68] ss:$48 sps:$4 sm:$0xff]   ;;  %v2144_v9 = vld [vmem:[#allocation2 + $0xc4] ss:$48 sps:$4 sm:$0xff]   ;;  %v2146_v10 = vld [vmem:[#allocation2 + $0xc0] ss:$48 sps:$4 sm:$0xff]  }
  0x2a   :  { %659 = vmatprep.subr.bf16.mxu0 %v2138_v5  ;;  %732 = vmatprep.subr.bf16.mxu1 %v2141_v7  ;;  %v2147_v11 = vld [vmem:[#allocation2 + $0xcc] ss:$48 sps:$4 sm:$0xff]   ;;  %v2150_v12 = vld [vmem:[#allocation2 + $0x124] ss:$48 sps:$4 sm:$0xff]   ;;  %v2149_v13 = vld [vmem:[#allocation2 + $0xc8] ss:$48 sps:$4 sm:$0xff]  }
  0x2b   :  { %v2153_v14 = vld [vmem:[#allocation2 + $0x12c] ss:$48 sps:$4 sm:$0xff]   ;;  %v2152_v15 = vld [vmem:[#allocation2 + $0x120] ss:$48 sps:$4 sm:$0xff]   ;;  %v2156_v16 = vld [vmem:[#allocation2 + $0x184] ss:$48 sps:$4 sm:$0xff]  }
  0x2c   :  { %v2155_v17 = vld [vmem:[#allocation2 + $0x128] ss:$48 sps:$4 sm:$0xff]   ;;  %v2159_v18 = vld [vmem:[#allocation2 + $0x18c] ss:$48 sps:$4 sm:$0xff]   ;;  %v2158_v19 = vld [vmem:[#allocation2 + $0x180] ss:$48 sps:$4 sm:$0xff]  }
  0x2d   :  { %660 = vmatpush1.bf16.msra.mxu0 %v2140_v6  ;;  %733 = vmatpush1.bf16.msra.mxu1 %v2143_v8  ;;  %v2162_v20 = vld [vmem:[#allocation2 + $0x1e4] ss:$48 sps:$4 sm:$0xff]   ;;  %v2161_v21 = vld [vmem:[#allocation2 + $0x188] ss:$48 sps:$4 sm:$0xff]   ;;  %v2165_v22 = vld [vmem:[#allocation2 + $0x1ec] ss:$48 sps:$4 sm:$0xff]  }
  0x2e   :  { %661 = vmatprep.subr.bf16.mxu0 %v2144_v9  ;;  %734 = vmatprep.subr.bf16.mxu1 %v2147_v11  ;;  %v2164_v23 = vld [vmem:[#allocation2 + $0x1e0] ss:$48 sps:$4 sm:$0xff]   ;;  %v2168_v24 = vld [vmem:[#allocation2 + $0x244] ss:$48 sps:$4 sm:$0xff]   ;;  %v2167_v25 = vld [vmem:[#allocation2 + $0x1e8] ss:$48 sps:$4 sm:$0xff]  }
  0x2f   :  { %v2171_v26 = vld [vmem:[#allocation2 + $0x24c] ss:$48 sps:$4 sm:$0xff]   ;;  %v2170_v27 = vld [vmem:[#allocation2 + $0x240] ss:$48 sps:$4 sm:$0xff]   ;;  %v2174_v28 = vld [vmem:[#allocation2 + $0x2a4] ss:$48 sps:$4 sm:$0xff]  }
  0x30   :  { %v2173_v29 = vld [vmem:[#allocation2 + $0x248] ss:$48 sps:$4 sm:$0xff]   ;;  %v2177_v30 = vld [vmem:[#allocation2 + $0x2ac] ss:$48 sps:$4 sm:$0xff]   ;;  %v2176_v31 = vld [vmem:[#allocation2 + $0x2a0] ss:$48 sps:$4 sm:$0xff]  }
  0x31   :  { %662 = vmatpush1.bf16.msra.mxu0 %v2146_v10  ;;  %735 = vmatpush1.bf16.msra.mxu1 %v2149_v13  ;;  %v2183_v32 = vld [vmem:[#allocation2 + $0x14] ss:$48 sps:$4 sm:$0xff]   ;;  %v2179_v33 = vld [vmem:[#allocation2 + $0x2a8] ss:$48 sps:$4 sm:$0xff]   ;;  %v2186_v35 = vld [vmem:[#allocation2 + $0x1c] ss:$48 sps:$4 sm:$0xff]  }
  0x32   :  { %663 = vmatprep.subr.bf16.mxu0 %v2150_v12  ;;  %736 = vmatprep.subr.bf16.mxu1 %v2153_v14  ;;  %v2397_v34 = vld [vmem:[%s2620_s0] sm:$0xff]   ;;  %v2184_v38 = vld [vmem:[#allocation2 + $0x18] ss:$48 sps:$4 sm:$0xff]   ;;  %v2192_v39 = vld [vmem:[#allocation2 + $0x7c] ss:$48 sps:$4 sm:$0xff]   ;;  %vm2336_vm0 = vmmov 0  }
  0x33   :  { %v2181_v36 = vld [vmem:[#allocation2 + $0x10] ss:$48 sps:$4 sm:$0xff]   ;;  %v2189_v37 = vld [vmem:[#allocation2 + $0x74] ss:$48 sps:$4 sm:$0xff]   ;;  %v2190_v42 = vld [vmem:[#allocation2 + $0x78] ss:$48 sps:$4 sm:$0xff]  }
  0x34   :  { %v2187_v40 = vld [vmem:[#allocation2 + $0x70] ss:$48 sps:$4 sm:$0xff]   ;;  %v2196_v41 = vld [vmem:[#allocation2 + $0xd4] ss:$48 sps:$4 sm:$0xff]   ;;  %v2199_v44 = vld [vmem:[#allocation2 + $0xdc] ss:$48 sps:$4 sm:$0xff]  }
  0x35   :  { %664 = vmatpush1.bf16.msra.mxu0 %v2152_v15  ;;  %737 = vmatpush1.bf16.msra.mxu1 %v2155_v17  ;;  %v2194_v45 = vld [vmem:[#allocation2 + $0xd0] ss:$48 sps:$4 sm:$0xff]   ;;  %v2202_v46 = vld [vmem:[#allocation2 + $0x134] ss:$48 sps:$4 sm:$0xff]   ;;  %v2197_v47 = vld [vmem:[#allocation2 + $0xd8] ss:$48 sps:$4 sm:$0xff]  }
  0x36   :  { %665 = vmatprep.subr.bf16.mxu0 %v2156_v16  ;;  %738 = vmatprep.subr.bf16.mxu1 %v2159_v18  ;;  %v2205_v48 = vld [vmem:[#allocation2 + $0x13c] ss:$48 sps:$4 sm:$0xff]   ;;  %v2200_v49 = vld [vmem:[#allocation2 + $0x130] ss:$48 sps:$4 sm:$0xff]   ;;  %v2209_v50 = vld [vmem:[#allocation2 + $0x194] ss:$48 sps:$4 sm:$0xff]  }
  0x37   :  { %v2203_v51 = vld [vmem:[#allocation2 + $0x138] ss:$48 sps:$4 sm:$0xff]   ;;  %v2415_v52 = vld [vmem:[%s2620_s0 + $0x10] sm:$0xff]   ;;  %v2212_v53 = vld [vmem:[#allocation2 + $0x19c] ss:$48 sps:$4 sm:$0xff]   ;;  %vm1182_vm1 = vcmask 1045504  }
  0x38   :  { %v2207_v54 = vld [vmem:[#allocation2 + $0x190] ss:$48 sps:$4 sm:$0xff]   ;;  %v2215_v55 = vld [vmem:[#allocation2 + $0x1f4] ss:$48 sps:$4 sm:$0xff]   ;;  %v2210_v56 = vld [vmem:[#allocation2 + $0x198] ss:$48 sps:$4 sm:$0xff]  }
  0x39   :  { %666 = vmatpush1.bf16.msra.mxu0 %v2158_v19  ;;  %739 = vmatpush1.bf16.msra.mxu1 %v2161_v21  ;;  %v2218_v57 = vld [vmem:[#allocation2 + $0x1fc] ss:$48 sps:$4 sm:$0xff]   ;;  %v2213_v58 = vld [vmem:[#allocation2 + $0x1f0] ss:$48 sps:$4 sm:$0xff]   ;;  %v2222_v59 = vld [vmem:[#allocation2 + $0x254] ss:$48 sps:$4 sm:$0xff]  }
  0x3a   :  { %667 = vmatprep.subr.bf16.mxu0 %v2162_v20  ;;  %740 = vmatprep.subr.bf16.mxu1 %v2165_v22  ;;  %v2216_v60 = vld [vmem:[#allocation2 + $0x1f8] ss:$48 sps:$4 sm:$0xff]   ;;  %v2225_v62 = vld [vmem:[#allocation2 + $0x25c] ss:$48 sps:$4 sm:$0xff]   ;;  %v2220_v63 = vld [vmem:[#allocation2 + $0x250] ss:$48 sps:$4 sm:$0xff]  }
  0x3b   :  { %v2424_v61 = vld [vmem:[%s2620_s0 + $0x18] sm:$0xff]   ;;  %v2228_v1 = vld [vmem:[#allocation2 + $0x2b4] ss:$48 sps:$4 sm:$0xff]   ;;  %v2226_v4 = vld [vmem:[#allocation2 + $0x2b0] ss:$48 sps:$4 sm:$0xff]   ;;  %vm1629_vm2 = vcmask 1041409  }
  0x3c   :  { %v2223_v2 = vld [vmem:[#allocation2 + $0x258] ss:$48 sps:$4 sm:$0xff]   ;;  %v2231_v3 = vld [vmem:[#allocation2 + $0x2bc] ss:$48 sps:$4 sm:$0xff]   ;;  %v2234_v5 = vld [vmem:[#allocation2 + $0x24] ss:$48 sps:$4 sm:$0xff]  }
  0x3d   :  { %668 = vmatpush1.bf16.msra.mxu0 %v2164_v23  ;;  %741 = vmatpush1.bf16.msra.mxu1 %v2167_v25  ;;  %v2229_v6 = vld [vmem:[#allocation2 + $0x2b8] ss:$48 sps:$4 sm:$0xff]   ;;  %v2237_v7 = vld [vmem:[#allocation2 + $0x2c] ss:$48 sps:$4 sm:$0xff]   ;;  %v2232_v8 = vld [vmem:[#allocation2 + $0x20] ss:$48 sps:$4 sm:$0xff]  }
  0x3e   :  { %669 = vmatprep.subr.bf16.mxu0 %v2168_v24  ;;  %742 = vmatprep.subr.bf16.mxu1 %v2171_v26  ;;  %v2240_v9 = vld [vmem:[#allocation2 + $0x84] ss:$48 sps:$4 sm:$0xff]   ;;  %v2235_v10 = vld [vmem:[#allocation2 + $0x28] ss:$48 sps:$4 sm:$0xff]   ;;  %v2243_v11 = vld [vmem:[#allocation2 + $0x8c] ss:$48 sps:$4 sm:$0xff]  }
  0x3f   :  { %v2238_v12 = vld [vmem:[#allocation2 + $0x80] ss:$48 sps:$4 sm:$0xff]   ;;  %v2246_v13 = vld [vmem:[#allocation2 + $0xe4] ss:$48 sps:$4 sm:$0xff]   ;;  %v2241_v14 = vld [vmem:[#allocation2 + $0x88] ss:$48 sps:$4 sm:$0xff]  }
  0x40   :  { %v2249_v15 = vld [vmem:[#allocation2 + $0xec] ss:$48 sps:$4 sm:$0xff]   ;;  %v2244_v16 = vld [vmem:[#allocation2 + $0xe0] ss:$48 sps:$4 sm:$0xff]   ;;  %v2252_v17 = vld [vmem:[#allocation2 + $0x144] ss:$48 sps:$4 sm:$0xff]  }
  0x41   :  { %670 = vmatpush1.bf16.msra.mxu0 %v2170_v27  ;;  %743 = vmatpush1.bf16.msra.mxu1 %v2173_v29  ;;  %v2247_v18 = vld [vmem:[#allocation2 + $0xe8] ss:$48 sps:$4 sm:$0xff]   ;;  %v2255_v19 = vld [vmem:[#allocation2 + $0x14c] ss:$48 sps:$4 sm:$0xff]   ;;  %v2250_v20 = vld [vmem:[#allocation2 + $0x140] ss:$48 sps:$4 sm:$0xff]  }
  0x42   :  { %671 = vmatprep.subr.bf16.mxu0 %v2174_v28  ;;  %744 = vmatprep.subr.bf16.mxu1 %v2177_v30  ;;  %v2258_v21 = vld [vmem:[#allocation2 + $0x1a4] ss:$48 sps:$4 sm:$0xff]   ;;  %v2253_v22 = vld [vmem:[#allocation2 + $0x148] ss:$48 sps:$4 sm:$0xff]   ;;  %v2261_v23 = vld [vmem:[#allocation2 + $0x1ac] ss:$48 sps:$4 sm:$0xff]  }
  0x43   :  { %v2256_v24 = vld [vmem:[#allocation2 + $0x1a0] ss:$48 sps:$4 sm:$0xff]   ;;  %v2264_v25 = vld [vmem:[#allocation2 + $0x204] ss:$48 sps:$4 sm:$0xff]   ;;  %v2259_v26 = vld [vmem:[#allocation2 + $0x1a8] ss:$48 sps:$4 sm:$0xff]  }
  0x44   :  { %v2267_v27 = vld [vmem:[#allocation2 + $0x20c] ss:$48 sps:$4 sm:$0xff]   ;;  %v2262_v28 = vld [vmem:[#allocation2 + $0x200] ss:$48 sps:$4 sm:$0xff]   ;;  %v2270_v29 = vld [vmem:[#allocation2 + $0x264] ss:$48 sps:$4 sm:$0xff]  }
  0x45   :  { %672 = vmatpush1.bf16.msra.mxu0 %v2176_v31  ;;  %745 = vmatpush1.bf16.msra.mxu1 %v2179_v33  ;;  %v2265_v30 = vld [vmem:[#allocation2 + $0x208] ss:$48 sps:$4 sm:$0xff]   ;;  %v2273_v31 = vld [vmem:[#allocation2 + $0x26c] ss:$48 sps:$4 sm:$0xff]   ;;  %v2276_v33 = vld [vmem:[#allocation2 + $0x2c4] ss:$48 sps:$4 sm:$0xff]  }
  0x46   :  { %803 = vmatprep.subr.bf16.mxu0 %v2183_v32  ;;  %876 = vmatprep.subr.bf16.mxu1 %v2186_v35  ;;  %v2268_v32 = vld [vmem:[#allocation2 + $0x260] ss:$48 sps:$4 sm:$0xff]   ;;  %v2271_v35 = vld [vmem:[#allocation2 + $0x268] ss:$48 sps:$4 sm:$0xff]   ;;  %vm1631_vm3 = vcmask 1042434   ;;  %vm1633_vm4 = vcmask 1043459  }
  0x47   :  { %vm1635_vm5 = vcmask 1044484   ;;  %vm1357_vm6 = vcmask 1044480   ;;  %vm1637_vm7 = vcmask 1045509   ;;  %vm1639_vm8 = vcmask 1046534  }
  0x48   :  { %690 = vmatmul.mubr.bf16.vlgmr.msra.gmra.mrb[0].mxu0 %v2397_v34  ;;  %763 = vmatmul.mubr.bf16.vlgmr.msra.gmra.mrb[0].mxu1 %v2397_v34  ;;  %vm1641_vm9 = vcmask 1047559   ;;  %vm1564_vm10 = vcmask 1043456  }
  0x49   :  { %804 = vmatpush1.bf16.msra.mxu0 %v2181_v36  ;;  %699 = vmatprep.mubr.bf16.mxu0 %v2334_v0  ;;  %v2279_v36 = vld [vmem:[#allocation2 + $0x2cc] ss:$48 sps:$4 sm:$0xff]  }
  0x4a   :  { %805 = vmatprep.subr.bf16.mxu0 %v2189_v37  ;;  %877 = vmatpush1.bf16.msra.mxu1 %v2184_v38  ;;  %v2274_v37 = vld [vmem:[#allocation2 + $0x2c0] ss:$48 sps:$4 sm:$0xff]   ;;  %v2277_v38 = vld [vmem:[#allocation2 + $0x2c8] ss:$48 sps:$4 sm:$0xff]  }
  0x4b   :  { %772 = vmatprep.mubr.bf16.mxu1 %v2334_v0  ;;  %878 = vmatprep.subr.bf16.mxu1 %v2192_v39  ;;  %v1693_v39 = vld [vmem:[#allocation4 + $0x88] sm:$0xff] }
  0x4d   :  { %806 = vmatpush1.bf16.msra.mxu0 %v2187_v40 }
  0x4e   :  { %807 = vmatprep.subr.bf16.mxu0 %v2196_v41  ;;  %879 = vmatpush1.bf16.msra.mxu1 %v2190_v42  ;;  %v1676_v41 = vld [vmem:[#allocation4] sm:$0xff]  ;;  %v1677_v42 = vld [vmem:[#allocation4 + $0x8] sm:$0xff] }
  0x4f   :  { %880 = vmatprep.subr.bf16.mxu1 %v2199_v44  ;;  %v1694_v44 = vld [vmem:[#allocation4 + $0x90] sm:$0xff] }
  0x50   :  { %700 = vmatmul.mubr.bf16.gmra.mrb[4].mxu0 %v2406_v43  ;;  %773 = vmatmul.mubr.bf16.gmra.mrb[4].mxu1 %v2406_v43 }
  0x51   :  { %808 = vmatpush1.bf16.msra.mxu0 %v2194_v45  ;;  %709 = vmatprep.mubr.bf16.mxu0 %v2334_v0  ;;  %v1695_v45 = vld [vmem:[#allocation4 + $0x98] sm:$0xff] }
  0x52   :  { %809 = vmatprep.subr.bf16.mxu0 %v2202_v46  ;;  %881 = vmatpush1.bf16.msra.mxu1 %v2197_v47  ;;  %v2070_v46 = vpack.c.bf16 %v1695_v45, %v1694_v44  ;;  %v1678_v47 = vld [vmem:[#allocation4 + $0x10] sm:$0xff]  ;;  %v1721_v44 = vld [vmem:[#allocation4 + $0x168] sm:$0xff] }
  0x53   :  { %782 = vmatprep.mubr.bf16.mxu1 %v2334_v0  ;;  %882 = vmatprep.subr.bf16.mxu1 %v2205_v48  ;;  %v1679_v48 = vld [vmem:[#allocation4 + $0x18] sm:$0xff] }
  0x55   :  { %810 = vmatpush1.bf16.msra.mxu0 %v2200_v49  ;;  %v2072_v49 = vpack.c.bf16 %v1679_v48, %v1678_v47  ;;  %v1722_v47 = vld [vmem:[#allocation4 + $0x170] sm:$0xff]  ;;  %v1723_v48 = vld [vmem:[#allocation4 + $0x178] sm:$0xff] }
  0x56   :  { %811 = vmatprep.subr.bf16.mxu0 %v2209_v50  ;;  %883 = vmatpush1.bf16.msra.mxu1 %v2203_v51  ;;  %v1697_v50 = vld [vmem:[#allocation4 + $0xa8] sm:$0xff] }
  0x57   :  { %884 = vmatprep.subr.bf16.mxu1 %v2212_v53  ;;  %v1681_v53 = vld [vmem:[#allocation4 + $0x28] sm:$0xff] }
  0x58   :  { %710 = vmatmul.mubr.bf16.gmra.mrb[8].mxu0 %v2415_v52  ;;  %783 = vmatmul.mubr.bf16.gmra.mrb[8].mxu1 %v2415_v52 }
  0x59   :  { %812 = vmatpush1.bf16.msra.mxu0 %v2207_v54  ;;  %719 = vmatprep.mubr.bf16.mxu0 %v2334_v0 }
  0x5a   :  { %813 = vmatprep.subr.bf16.mxu0 %v2215_v55  ;;  %885 = vmatpush1.bf16.msra.mxu1 %v2210_v56  ;;  %v1698_v55 = vld [vmem:[#allocation4 + $0xb0] sm:$0xff]  ;;  %v1699_v56 = vld [vmem:[#allocation4 + $0xb8] sm:$0xff] }
  0x5b   :  { %792 = vmatprep.mubr.bf16.mxu1 %v2334_v0  ;;  %886 = vmatprep.subr.bf16.mxu1 %v2218_v57  ;;  %v2078_v57 = vpack.c.bf16 %v1699_v56, %v1698_v55 }
  0x5d   :  { %814 = vmatpush1.bf16.msra.mxu0 %v2213_v58  ;;  %v1682_v58 = vld [vmem:[#allocation4 + $0x30] sm:$0xff] }
  0x5e   :  { %815 = vmatprep.subr.bf16.mxu0 %v2222_v59  ;;  %887 = vmatpush1.bf16.msra.mxu1 %v2216_v60  ;;  %v1683_v59 = vld [vmem:[#allocation4 + $0x38] sm:$0xff] }
  0x5f   :  { %888 = vmatprep.subr.bf16.mxu1 %v2225_v62  ;;  %v2080_v60 = vpack.c.bf16 %v1683_v59, %v1682_v58  ;;  %v1701_v62 = vld [vmem:[#allocation4 + $0xc8] sm:$0xff] }
  0x60   :  { %720 = vmatmul.mubr.bf16.gmra.mrb[12].mxu0 %v2424_v61  ;;  %793 = vmatmul.mubr.bf16.gmra.mrb[12].mxu1 %v2424_v61 }
  0x61   :  { %816 = vmatpush1.bf16.msra.mxu0 %v2220_v63  ;;  %835 = vmatprep.mubr.bf16.mxu0 %v2334_v0 }
  0x62   :  { %817 = vmatprep.subr.bf16.mxu0 %v2228_v1  ;;  %889 = vmatpush1.bf16.msra.mxu1 %v2223_v2  ;;  %v1684_v1 = vld [vmem:[#allocation4 + $0x40] sm:$0xff]  ;;  %v1685_v2 = vld [vmem:[#allocation4 + $0x48] sm:$0xff] }
  0x63   :  { %908 = vmatprep.mubr.bf16.mxu1 %v2334_v0  ;;  %890 = vmatprep.subr.bf16.mxu1 %v2231_v3  ;;  %v2084_v3 = vpack.c.bf16 %v1685_v2, %v1684_v1 }
  0x65   :  { %818 = vmatpush1.bf16.msra.mxu0 %v2226_v4  ;;  %v1702_v4 = vld [vmem:[#allocation4 + $0xd0] sm:$0xff] }
  0x66   :  { %949 = vmatprep.subr.bf16.mxu0 %v2234_v5  ;;  %891 = vmatpush1.bf16.msra.mxu1 %v2229_v6  ;;  %v1703_v5 = vld [vmem:[#allocation4 + $0xd8] sm:$0xff] }
  0x67   :  { %1022 = vmatprep.subr.bf16.mxu1 %v2237_v7  ;;  %v2086_v6 = vpack.c.bf16 %v1703_v5, %v1702_v4  ;;  %v1686_v7 = vld [vmem:[#allocation4 + $0x50] sm:$0xff] }
  0x68   :  { %836 = vmatmul.mubr.bf16.vlgmr.msra.gmra.mrb[16].mxu0 %v2397_v34 }
  0x69   :  { %950 = vmatpush1.bf16.msra.mxu0 %v2232_v8  ;;  %845 = vmatprep.mubr.bf16.mxu0 %v2334_v0  ;;  %v1687_v8 = vld [vmem:[#allocation4 + $0x58] sm:$0xff] }
  0x6a   :  { %909 = vmatmul.mubr.bf16.vlgmr.msra.gmra.mrb[16].mxu1 %v2397_v34  ;;  %951 = vmatprep.subr.bf16.mxu0 %v2240_v9  ;;  %v2088_v9 = vpack.c.bf16 %v1687_v8, %v1686_v7 }
  0x6b   :  { %1023 = vmatpush1.bf16.msra.mxu1 %v2235_v10  ;;  %918 = vmatprep.mubr.bf16.mxu1 %v2334_v0  ;;  %v1704_v10 = vld [vmem:[#allocation4 + $0xe0] sm:$0xff] }
  0x6c   :  { %1024 = vmatprep.subr.bf16.mxu1 %v2243_v11  ;;  %v1705_v11 = vld [vmem:[#allocation4 + $0xe8] sm:$0xff] }
  0x6d   :  { %952 = vmatpush1.bf16.msra.mxu0 %v2238_v12  ;;  %v2090_v12 = vpack.c.bf16 %v1705_v11, %v1704_v10 }
  0x6e   :  { %953 = vmatprep.subr.bf16.mxu0 %v2246_v13  ;;  %v1688_v13 = vld [vmem:[#allocation4 + $0x60] sm:$0xff] }
  0x6f   :  { %1025 = vmatpush1.bf16.msra.mxu1 %v2241_v14  ;;  %v1689_v14 = vld [vmem:[#allocation4 + $0x68] sm:$0xff] }
  0x70   :  { %846 = vmatmul.mubr.bf16.gmra.mrb[20].mxu0 %v2406_v43  ;;  %1026 = vmatprep.subr.bf16.mxu1 %v2249_v15  ;;  %v2092_v15 = vpack.c.bf16 %v1689_v14, %v1688_v13 }
  0x71   :  { %954 = vmatpush1.bf16.msra.mxu0 %v2244_v16  ;;  %855 = vmatprep.mubr.bf16.mxu0 %v2334_v0  ;;  %v1706_v16 = vld [vmem:[#allocation4 + $0xf0] sm:$0xff] }
  0x72   :  { %919 = vmatmul.mubr.bf16.gmra.mrb[20].mxu1 %v2406_v43  ;;  %955 = vmatprep.subr.bf16.mxu0 %v2252_v17  ;;  %v1707_v17 = vld [vmem:[#allocation4 + $0xf8] sm:$0xff] }
  0x73   :  { %1027 = vmatpush1.bf16.msra.mxu1 %v2247_v18  ;;  %928 = vmatprep.mubr.bf16.mxu1 %v2334_v0  ;;  %v2094_v18 = vpack.c.bf16 %v1707_v17, %v1706_v16 }
  0x74   :  { %1028 = vmatprep.subr.bf16.mxu1 %v2255_v19  ;;  %v1690_v19 = vld [vmem:[#allocation4 + $0x70] sm:$0xff] }
  0x75   :  { %956 = vmatpush1.bf16.msra.mxu0 %v2250_v20  ;;  %v1691_v20 = vld [vmem:[#allocation4 + $0x78] sm:$0xff] }
  0x76   :  { %957 = vmatprep.subr.bf16.mxu0 %v2258_v21  ;;  %v2096_v21 = vpack.c.bf16 %v1691_v20, %v1690_v19 }
  0x77   :  { %1029 = vmatpush1.bf16.msra.mxu1 %v2253_v22  ;;  %v1708_v22 = vld [vmem:[#allocation4 + $0x100] sm:$0xff] }
  0x78   :  { %856 = vmatmul.mubr.bf16.gmra.mrb[24].mxu0 %v2415_v52  ;;  %1030 = vmatprep.subr.bf16.mxu1 %v2261_v23  ;;  %v1709_v23 = vld [vmem:[#allocation4 + $0x108] sm:$0xff] }
  0x79   :  { %958 = vmatpush1.bf16.msra.mxu0 %v2256_v24  ;;  %865 = vmatprep.mubr.bf16.mxu0 %v2334_v0  ;;  %v2099_v24 = vpack.c.bf16 %v1709_v23, %v1708_v22 }
  0x7a   :  { %929 = vmatmul.mubr.bf16.gmra.mrb[24].mxu1 %v2415_v52  ;;  %959 = vmatprep.subr.bf16.mxu0 %v2264_v25  ;;  %v2335_v25 = vmov 0.0|0.0  }
  0x7b   :  { %1031 = vmatpush1.bf16.msra.mxu1 %v2259_v26  ;;  %938 = vmatprep.mubr.bf16.mxu1 %v2334_v0  ;;  %v1710_v26 = vld [vmem:[#allocation4 + $0x110] sm:$0xff] }
  0x7c   :  { %1032 = vmatprep.subr.bf16.mxu1 %v2267_v27  ;;  %v1711_v27 = vld [vmem:[#allocation4 + $0x118] sm:$0xff] }
  0x7d   :  { %960 = vmatpush1.bf16.msra.mxu0 %v2262_v28  ;;  %v2102_v28 = vpack.c.bf16 %v1711_v27, %v1710_v26 }
  0x7e   :  { %961 = vmatprep.subr.bf16.mxu0 %v2270_v29  ;;  %v1712_v29 = vld [vmem:[#allocation4 + $0x120] sm:$0xff] }
  0x7f   :  { %1033 = vmatpush1.bf16.msra.mxu1 %v2265_v30  ;;  %v1713_v30 = vld [vmem:[#allocation4 + $0x128] sm:$0xff] }
  0x80   :  { %866 = vmatmul.mubr.bf16.gmra.mrb[28].mxu0 %v2424_v61  ;;  %1034 = vmatprep.subr.bf16.mxu1 %v2273_v31  ;;  %v2105_v31 = vpack.c.bf16 %v1713_v30, %v1712_v29 }
  0x81   :  { %962 = vmatpush1.bf16.msra.mxu0 %v2268_v32  ;;  %981 = vmatprep.mubr.bf16.mxu0 %v2334_v0  ;;  %v1714_v32 = vld [vmem:[#allocation4 + $0x130] sm:$0xff] }
  0x82   :  { %939 = vmatmul.mubr.bf16.gmra.mrb[28].mxu1 %v2424_v61  ;;  %963 = vmatprep.subr.bf16.mxu0 %v2276_v33  ;;  %v1715_v33 = vld [vmem:[#allocation4 + $0x138] sm:$0xff] }
  0x83   :  { %1035 = vmatpush1.bf16.msra.mxu1 %v2271_v35  ;;  %1054 = vmatprep.mubr.bf16.mxu1 %v2334_v0  ;;  %v2108_v35 = vpack.c.bf16 %v1715_v33, %v1714_v32 }
  0x84   :  { %1036 = vmatprep.subr.bf16.mxu1 %v2279_v36  ;;  %v1716_v36 = vld [vmem:[#allocation4 + $0x140] sm:$0xff] }
  0x85   :  { %964 = vmatpush1.bf16.msra.mxu0 %v2274_v37  ;;  %v1717_v37 = vld [vmem:[#allocation4 + $0x148] sm:$0xff] }
  0x87   :  { %1037 = vmatpush1.bf16.msra.mxu1 %v2277_v38  ;;  %v2111_v38 = vpack.c.bf16 %v1717_v37, %v1716_v36 }
  0x88   :  { %982 = vmatmul.mubr.bf16.vlgmr.msra.gmra.mrb[32].mxu0 %v2397_v34  ;;  %2098 = vmatprep.subr.bf16.mxu1 %v2335_v25 }
  0x89   :  { %991 = vmatprep.mubr.bf16.mxu0 %v2334_v0 }
  0x8a   :  { %1055 = vmatmul.mubr.bf16.vlgmr.msra.gmra.mrb[32].mxu1 %v2397_v34  ;;  %v1692_v34 = vld [vmem:[#allocation4 + $0x80] sm:$0xff] }
  0x8b   :  { %1064 = vmatprep.mubr.bf16.mxu1 %v2334_v0  ;;  %v2066_v40 = vpack.c.bf16 %v1693_v39, %v1692_v34  ;;  %2100 = vmatpush3.bf16.msra.mxu1 %v2099_v24  ;;  %v1718_v34 = vld [vmem:[#allocation4 + $0x150] sm:$0xff]  ;;  %v1719_v39 = vld [vmem:[#allocation4 + $0x158] sm:$0xff] }
  0x8c   :  { %2101 = vmatprep.subr.bf16.mxu1 %v2335_v25 }
  0x8d   :  { %2067 = vmatprep.subr.bf16.mxu0 %v2066_v40  ;;  %v1161_v40 = vlaneseq }
  0x8f   :  { %2103 = vmatpush3.bf16.msra.mxu1 %v2102_v28  ;;  %v1162_v45 = vshrl.u32 %v1161_v40, 7 }
  0x90   :  { %992 = vmatmul.mubr.bf16.gmra.mrb[36].mxu0 %v2406_v43  ;;  %2104 = vmatprep.subr.bf16.mxu1 %v2335_v25 }
  0x91   :  { %1001 = vmatprep.mubr.bf16.mxu0 %v2334_v0 }
  0x92   :  { %1065 = vmatmul.mubr.bf16.gmra.mrb[36].mxu1 %v2406_v43  ;;  %v2068_v43 = vpack.c.bf16 %v1677_v42, %v1676_v41  ;;  %v2337_v41 = vmov 0.0   ;;  %v2114_v42 = vpack.c.bf16 %v1719_v39, %v1718_v34 }
  0x93   :  { %1074 = vmatprep.mubr.bf16.mxu1 %v2334_v0  ;;  %2106 = vmatpush3.bf16.msra.mxu1 %v2105_v31 }
  0x94   :  { %2069 = vmatpush3.bf16.msra.mxu0 %v2068_v43  ;;  %2107 = vmatprep.subr.bf16.mxu1 %v2335_v25  ;;  %v1720_v43 = vld [vmem:[#allocation4 + $0x160] sm:$0xff] }
  0x95   :  { %2071 = vmatprep.subr.bf16.mxu0 %v2070_v46  ;;  %v2117_v46 = vpack.c.bf16 %v1721_v44, %v1720_v43 }
  0x97   :  { %2109 = vmatpush3.bf16.msra.mxu1 %v2108_v35 }
  0x98   :  { %1002 = vmatmul.mubr.bf16.gmra.mrb[40].mxu0 %v2415_v52  ;;  %2110 = vmatprep.subr.bf16.mxu1 %v2335_v25 }
  0x99   :  { %1011 = vmatprep.mubr.bf16.mxu0 %v2334_v0  ;;  %2073 = vmatpush3.bf16.msra.mxu0 %v2072_v49 }
  0x9a   :  { %1075 = vmatmul.mubr.bf16.gmra.mrb[40].mxu1 %v2415_v52  ;;  %v1680_v52 = vld [vmem:[#allocation4 + $0x20] sm:$0xff] }
  0x9b   :  { %1084 = vmatprep.mubr.bf16.mxu1 %v2334_v0  ;;  %v1696_v0 = vld [vmem:[#allocation4 + $0xa0] sm:$0xff]  ;;  %v2076_v54 = vpack.c.bf16 %v1681_v53, %v1680_v52  ;;  %2112 = vmatpush3.bf16.msra.mxu1 %v2111_v38  ;;  %v2120_v52 = vpack.c.bf16 %v1723_v48, %v1722_v47 }
  0x9c   :  { %v2074_v51 = vpack.c.bf16 %v1697_v50, %v1696_v0  ;;  %2113 = vmatprep.subr.bf16.mxu1 %v2335_v25  ;;  %v2460_v0 = vsub.s32 0, %v1162_v45 }
  0x9e   :  { %2075 = vmatprep.subr.bf16.mxu0 %v2074_v51  ;;  %v2465_v51 = vld [vmem:[%s2622_s2] sm:$0x7] }
  0x9f   :  { %2077 = vmatpush3.bf16.msra.mxu0 %v2076_v54  ;;  %2115 = vmatpush3.bf16.msra.mxu1 %v2114_v42 }
  0xa0   :  { %1012 = vmatmul.mubr.bf16.gmra.mrb[44].mxu0 %v2424_v61  ;;  %2079 = vmatprep.subr.bf16.mxu0 %v2078_v57 }
  0xa1   :  { %2116 = vmatprep.subr.bf16.mxu1 %v2335_v25 }
  0xa2   :  { %1085 = vmatmul.mubr.bf16.gmra.mrb[44].mxu1 %v2424_v61  ;;  %v1700_v61 = vld [vmem:[#allocation4 + $0xc0] sm:$0xff] }
  0xa3   :  { %2081 = vmatpush3.bf16.msra.mxu0 %v2080_v60  ;;  %v2082_v63 = vpack.c.bf16 %v1701_v62, %v1700_v61  ;;  %2063 = vmatprep.mubr.msk.f32.mxu1 %vm2336_vm0, %v2337_v41  ;;  %v2471_v60 = vrot.slane %v2465_v51, %v2460_v0 }
  0xa4   :  { %2118 = vmatpush3.bf16.msra.mxu1 %v2117_v46 }
  0xa5   :  { %2083 = vmatprep.subr.bf16.mxu0 %v2082_v63  ;;  %2119 = vmatprep.subr.bf16.mxu1 %v2335_v25 }
  0xa7   :  { %2085 = vmatpush3.bf16.msra.mxu0 %v2084_v3 }
  0xa8   :  { %2087 = vmatprep.subr.bf16.mxu0 %v2086_v6  ;;  %2121 = vmatpush3.bf16.msra.mxu1 %v2120_v52 }
  0xab   :  { %2089 = vmatpush3.bf16.msra.mxu0 %v2088_v9 }
  0xac   :  { %2091 = vmatprep.subr.bf16.mxu0 %v2090_v12 }
  0xaf   :  { %2093 = vmatpush3.bf16.msra.mxu0 %v2092_v15 }
  0xb0   :  { %2095 = vmatprep.subr.bf16.mxu0 %v2094_v18 }
  0xb3   :  { %2097 = vmatpush3.bf16.msra.mxu0 %v2096_v21 }
 0x11b   :  { %v691_v49 = vpop.f32.mrb[0].mxu0  ;;  %v764_v55 = vpop.f32.mrb[0].mxu1 }
 0x11c   :  { %v693_v50 = vpop.f32.mrb[1].mxu0  ;;  %v1136_v56 = vrot.slane %v764_v55, 2  ;;  %v2467_v58 = vpop.f32.mrb[1].mxu1 }
 0x11d   :  { %v1104_v53 = vrot.slane %v693_v50, 1  ;;  %v695_v54 = vpop.f32.mrb[2].mxu0  ;;  %v768_v62 = vpop.f32.mrb[2].mxu1 }
 0x11e   :  { %v697_v57 = vpop.f32.mrb[3].mxu0  ;;  %v1137_v63 = vrot.slane %v768_v62, 2  ;;  %v2473_v1 = vpop.f32.mrb[3].mxu1 }
 0x11f   :  { %v1120_v59 = vadd.f32 %v1104_v53, %v691_v49  ;;  %v1105_v61 = vrot.slane %v697_v57, 1 }
 0x121   :  { %v1152_v2 = vadd.f32 %v1136_v56, %v1120_v59  ;;  %v1121_v3 = vadd.f32 %v1105_v61, %v695_v54  ;;  %v1335_v61 = vrot.slane %v2465_v51, 1 }
 0x123   :  { %v1166_v4 = vadd.f32 %v2471_v60, %v1152_v2  ;;  %v1153_v5 = vadd.f32 %v1137_v63, %v1121_v3  ;;  %v701_v6 = vpop.f32.mrb[4].mxu0  ;;  %v774_v12 = vpop.f32.mrb[4].mxu1 }
 0x124   :  { %v703_v7 = vpop.f32.mrb[5].mxu0  ;;  %v1138_v13 = vrot.slane %v774_v12, 2  ;;  %v2477_v15 = vpop.f32.mrb[5].mxu1 }
 0x125   :  { %v1174_v8 = vmax.f32 %v1166_v4, 0.0  ;;  %v1167_v9 = vadd.f32 %v2471_v60, %v1153_v5  ;;  %v1106_v10 = vrot.slane %v703_v7, 1  ;;  %v705_v11 = vpop.f32.mrb[6].mxu0  ;;  %v778_v20 = vpop.f32.mrb[6].mxu1 }
 0x126   :  { %v707_v14 = vpop.f32.mrb[7].mxu0  ;;  %v1139_v22 = vrot.slane %v778_v20, 2  ;;  %v2480_v23 = vpop.f32.mrb[7].mxu1 }
 0x127   :  { %v1183_v16 = vsel %vm1182_vm1, %v1174_v8, -inf  ;;  %v1175_v17 = vmax.f32 %v1167_v9, 0.0  ;;  %v1122_v18 = vadd.f32 %v1106_v10, %v701_v6  ;;  %v1107_v19 = vrot.slane %v707_v14, 1 }
 0x128   :  { %v1184_v21 = vrot.slane %v1183_v16, 4 }
 0x129   :  { %v1190_v24 = vsel %vm1182_vm1, %v1175_v17, -inf  ;;  %v1154_v25 = vadd.f32 %v1138_v13, %v1122_v18  ;;  %v1123_v26 = vadd.f32 %v1107_v19, %v705_v11  ;;  %v2495_v17 = vrot.slane %v1335_v61, %v2460_v0 }
 0x12a   :  { %v1185_v27 = vmax.f32 %v1183_v16, %v1184_v21  ;;  %v1191_v28 = vrot.slane %v1190_v24, 4 }
 0x12b   :  { %v1168_v29 = vadd.f32 %v2471_v60, %v1154_v25  ;;  %v1155_v30 = vadd.f32 %v1139_v22, %v1123_v26  ;;  %v711_v31 = vpop.f32.mrb[8].mxu0  ;;  %v784_v39 = vpop.f32.mrb[8].mxu1 }
 0x12c   :  { %v1186_v32 = vrot.slane %v1185_v27, 2  ;;  %v1192_v33 = vmax.f32 %v1190_v24, %v1191_v28  ;;  %v713_v35 = vpop.f32.mrb[9].mxu0  ;;  %v1140_v42 = vrot.slane %v784_v39, 2  ;;  %v2485_v44 = vpop.f32.mrb[9].mxu1 }
 0x12d   :  { %v1176_v36 = vmax.f32 %v1168_v29, 0.0  ;;  %v1169_v37 = vadd.f32 %v2471_v60, %v1155_v30  ;;  %v1108_v38 = vrot.slane %v713_v35, 1  ;;  %v715_v34 = vpop.f32.mrb[10].mxu0  ;;  %v788_v49 = vpop.f32.mrb[10].mxu1 }
 0x12e   :  { %v1187_v40 = vmax.f32 %v1185_v27, %v1186_v32  ;;  %v1193_v41 = vrot.slane %v1192_v33, 2  ;;  %v717_v43 = vpop.f32.mrb[11].mxu0  ;;  %v1141_v54 = vrot.slane %v788_v49, 2  ;;  %v2488_v55 = vpop.f32.mrb[11].mxu1 }
 0x12f   :  { %v1197_v45 = vsel %vm1182_vm1, %v1176_v36, -inf  ;;  %v1177_v46 = vmax.f32 %v1169_v37, 0.0  ;;  %v1124_v47 = vadd.f32 %v1108_v38, %v711_v31  ;;  %v1109_v48 = vrot.slane %v717_v43, 1 }
 0x130   :  { %v1188_v50 = vrot.slane %v1187_v40, 1  ;;  %v1194_v52 = vmax.f32 %v1192_v33, %v1193_v41  ;;  %v1198_v53 = vrot.slane %v1197_v45, 4 }
 0x131   :  { %v1204_v56 = vsel %vm1182_vm1, %v1177_v46, -inf  ;;  %v1156_v57 = vadd.f32 %v1140_v42, %v1124_v47  ;;  %v1125_v59 = vadd.f32 %v1109_v48, %v715_v34 }
 0x132   :  { %v1195_v62 = vrot.slane %v1194_v52, 1  ;;  %v1199_v63 = vmax.f32 %v1197_v45, %v1198_v53  ;;  %v1205_v2 = vrot.slane %v1204_v56, 4  ;;  %v1189_v6 = vmax.f32 %v1187_v40, %v1188_v50 }
 0x133   :  { %v1170_v3 = vadd.f32 %v2471_v60, %v1156_v57  ;;  %v1157_v4 = vadd.f32 %v1141_v54, %v1125_v59  ;;  %v721_v5 = vpop.f32.mrb[12].mxu0  ;;  %v794_v16 = vpop.f32.mrb[12].mxu1 }
 0x134   :  { %v1196_v7 = vmax.f32 %v1194_v52, %v1195_v62  ;;  %v1200_v8 = vrot.slane %v1199_v63, 2  ;;  %v1206_v9 = vmax.f32 %v1204_v56, %v1205_v2  ;;  %v723_v10 = vpop.f32.mrb[13].mxu0  ;;  %v1142_v21 = vrot.slane %v794_v16, 2  ;;  %v2498_v24 = vpop.f32.mrb[13].mxu1 }
 0x135   :  { %v1178_v11 = vmax.f32 %v1170_v3, 0.0  ;;  %v1171_v12 = vadd.f32 %v2471_v60, %v1157_v4  ;;  %v1110_v13 = vrot.slane %v723_v10, 1  ;;  %v725_v14 = vpop.f32.mrb[14].mxu0  ;;  %v798_v29 = vpop.f32.mrb[14].mxu1 }
 0x136   :  { %v1630_v18 = vsel %vm1629_vm2, %v1196_v7, %v1189_v6  ;;  %v1201_v19 = vmax.f32 %v1199_v63, %v1200_v8  ;;  %v1207_v20 = vrot.slane %v1206_v9, 2  ;;  %v727_v22 = vpop.f32.mrb[15].mxu0  ;;  %v1143_v33 = vrot.slane %v798_v29, 2  ;;  %v2501_v35 = vpop.f32.mrb[15].mxu1 }
 0x137   :  { %v1211_v25 = vsel %vm1182_vm1, %v1178_v11, -inf  ;;  %v1179_v26 = vmax.f32 %v1171_v12, 0.0  ;;  %v1126_v27 = vadd.f32 %v1110_v13, %v721_v5  ;;  %v1111_v28 = vrot.slane %v727_v22, 1 }
 0x138   :  { %v1202_v30 = vrot.slane %v1201_v19, 1  ;;  %v1208_v31 = vmax.f32 %v1206_v9, %v1207_v20  ;;  %v1212_v32 = vrot.slane %v1211_v25, 4 }
 0x139   :  { %v1218_v36 = vsel %vm1182_vm1, %v1179_v26, -inf  ;;  %v1158_v37 = vadd.f32 %v1142_v21, %v1126_v27  ;;  %v1127_v38 = vadd.f32 %v1111_v28, %v725_v14 }
 0x13a   :  { %v1203_v34 = vmax.f32 %v1201_v19, %v1202_v30  ;;  %v1209_v39 = vrot.slane %v1208_v31, 1  ;;  %v1213_v40 = vmax.f32 %v1211_v25, %v1212_v32  ;;  %v1219_v41 = vrot.slane %v1218_v36, 4 }
 0x13b   :  { %v1172_v42 = vadd.f32 %v2471_v60, %v1158_v37  ;;  %v1159_v43 = vadd.f32 %v1143_v33, %v1127_v38  ;;  %v837_v45 = vpop.f32.mrb[16].mxu0 }
 0x13c   :  { %v1210_v46 = vmax.f32 %v1208_v31, %v1209_v39  ;;  %v1214_v47 = vrot.slane %v1213_v40, 2  ;;  %v1220_v48 = vmax.f32 %v1218_v36, %v1219_v41  ;;  %v1247_v49 = vrot.slane %v837_v45, 1  ;;  %v839_v50 = vpop.f32.mrb[17].mxu0 }
 0x13d   :  { %v1180_v52 = vmax.f32 %v1172_v42, 0.0  ;;  %v1173_v53 = vadd.f32 %v2471_v60, %v1159_v43  ;;  %v1279_v54 = vrot.slane %v839_v50, 2  ;;  %v841_v56 = vpop.f32.mrb[18].mxu0  ;;  %v910_v57 = vpop.f32.mrb[16].mxu1  ;;  %v1632_v59 = vsel %vm1631_vm3, %v1203_v34, %v1630_v18 }
 0x13e   :  { %v1215_v61 = vmax.f32 %v1213_v40, %v1214_v47  ;;  %v1221_v62 = vrot.slane %v1220_v48, 2  ;;  %v1263_v63 = vadd.f32 %v1247_v49, %v2467_v58  ;;  %v1248_v2 = vrot.slane %v841_v56, 1  ;;  %v843_v3 = vpop.f32.mrb[19].mxu0  ;;  %v2508_v4 = vpop.f32.mrb[17].mxu1 }
 0x13f   :  { %v1225_v5 = vsel %vm1182_vm1, %v1180_v52, -inf  ;;  %v1181_v6 = vmax.f32 %v1173_v53, 0.0  ;;  %v1311_v7 = vrot.slane %v910_v57, 3  ;;  %v1280_v8 = vrot.slane %v843_v3, 2  ;;  %v914_v60 = vpop.f32.mrb[18].mxu1 }
 0x140   :  { %v1216_v9 = vrot.slane %v1215_v61, 1  ;;  %v1222_v10 = vmax.f32 %v1220_v48, %v1221_v62  ;;  %v1226_v11 = vrot.slane %v1225_v5, 4  ;;  %v1295_v12 = vadd.f32 %v1279_v54, %v1263_v63  ;;  %v2511_v13 = vpop.f32.mrb[19].mxu1 }
 0x141   :  { %v1232_v14 = vsel %vm1182_vm1, %v1181_v6, -inf  ;;  %v1264_v58 = vadd.f32 %v1248_v2, %v2473_v1  ;;  %v1634_v16 = vsel %vm1633_vm4, %v1210_v46, %v1632_v59  ;;  %v1312_v26 = vrot.slane %v914_v60, 3 }
 0x142   :  { %v1217_v18 = vmax.f32 %v1215_v61, %v1216_v9  ;;  %v1223_v19 = vrot.slane %v1222_v10, 1  ;;  %v1227_v20 = vmax.f32 %v1225_v5, %v1226_v11  ;;  %v1233_v21 = vrot.slane %v1232_v14, 4 }
 0x143   :  { %v1327_v22 = vadd.f32 %v1311_v7, %v1295_v12  ;;  %v1296_v25 = vadd.f32 %v1280_v8, %v1264_v58  ;;  %v847_v27 = vpop.f32.mrb[20].mxu0  ;;  %v1542_v60 = vrot.slane %v2465_v51, 2 }
 0x144   :  { %v1224_v28 = vmax.f32 %v1222_v10, %v1223_v19  ;;  %v1228_v29 = vrot.slane %v1227_v20, 2  ;;  %v1234_v30 = vmax.f32 %v1232_v14, %v1233_v21  ;;  %v1249_v31 = vrot.slane %v847_v27, 1  ;;  %v849_v32 = vpop.f32.mrb[21].mxu0 }
 0x145   :  { %v1341_v33 = vadd.f32 %v2495_v17, %v1327_v22  ;;  %v1328_v1 = vadd.f32 %v1312_v26, %v1296_v25  ;;  %v1281_v36 = vrot.slane %v849_v32, 2  ;;  %v851_v37 = vpop.f32.mrb[22].mxu0  ;;  %v920_v38 = vpop.f32.mrb[20].mxu1  ;;  %v1636_v34 = vsel %vm1635_vm5, %v1217_v18, %v1634_v16 }
 0x146   :  { %v1229_v39 = vmax.f32 %v1227_v20, %v1228_v29  ;;  %v1235_v40 = vrot.slane %v1234_v30, 2  ;;  %v1265_v41 = vadd.f32 %v1249_v31, %v2477_v15  ;;  %v1250_v42 = vrot.slane %v851_v37, 1  ;;  %v853_v43 = vpop.f32.mrb[23].mxu0  ;;  %v2519_v45 = vpop.f32.mrb[21].mxu1 }
 0x147   :  { %v1349_v46 = vmax.f32 %v1341_v33, 0.0  ;;  %v1342_v47 = vadd.f32 %v2495_v17, %v1328_v1  ;;  %v1313_v48 = vrot.slane %v920_v38, 3  ;;  %v1282_v49 = vrot.slane %v853_v43, 2  ;;  %v924_v50 = vpop.f32.mrb[22].mxu1 }
 0x148   :  { %v1230_v52 = vrot.slane %v1229_v39, 1  ;;  %v1236_v53 = vmax.f32 %v1234_v30, %v1235_v40  ;;  %v1297_v54 = vadd.f32 %v1281_v36, %v1265_v41  ;;  %v1266_v56 = vadd.f32 %v1250_v42, %v2480_v23  ;;  %v2523_v57 = vpop.f32.mrb[23].mxu1 }
 0x149   :  { %v1358_v59 = vsel %vm1357_vm6, %v1349_v46, -inf  ;;  %v1350_v15 = vmax.f32 %v1342_v47, 0.0  ;;  %v1638_v61 = vsel %vm1637_vm7, %v1224_v28, %v1636_v34  ;;  %v1314_v7 = vrot.slane %v924_v50, 3 }
 0x14a   :  { %v1231_v62 = vmax.f32 %v1229_v39, %v1230_v52  ;;  %v1237_v63 = vrot.slane %v1236_v53, 1  ;;  %v1359_v2 = vrot.slane %v1358_v59, 4  ;;  %v1329_v3 = vadd.f32 %v1313_v48, %v1297_v54 }
 0x14b   :  { %v1365_v5 = vsel %vm1357_vm6, %v1350_v15, -inf  ;;  %v1298_v6 = vadd.f32 %v1282_v49, %v1266_v56  ;;  %v857_v8 = vpop.f32.mrb[24].mxu0  ;;  %v2540_v40 = vrot.slane %v1542_v60, %v2460_v0 }
 0x14c   :  { %v1360_v23 = vmax.f32 %v1358_v59, %v1359_v2  ;;  %v1366_v9 = vrot.slane %v1365_v5, 4  ;;  %v1343_v10 = vadd.f32 %v2495_v17, %v1329_v3  ;;  %v1251_v11 = vrot.slane %v857_v8, 1  ;;  %v859_v12 = vpop.f32.mrb[25].mxu0 }
 0x14d   :  { %v1330_v14 = vadd.f32 %v1314_v7, %v1298_v6  ;;  %v1283_v58 = vrot.slane %v859_v12, 2  ;;  %v861_v16 = vpop.f32.mrb[26].mxu0  ;;  %v930_v18 = vpop.f32.mrb[24].mxu1  ;;  %v1238_v19 = vmax.f32 %v1236_v53, %v1237_v63  ;;  %v1640_v20 = vsel %vm1639_vm8, %v1231_v62, %v1638_v61 }
 0x14e   :  { %v1361_v21 = vrot.slane %v1360_v23, 2  ;;  %v1367_v22 = vmax.f32 %v1365_v5, %v1366_v9  ;;  %v1351_v25 = vmax.f32 %v1343_v10, 0.0  ;;  %v1267_v26 = vadd.f32 %v1251_v11, %v2485_v44  ;;  %v863_v27 = vpop.f32.mrb[27].mxu0  ;;  %v2532_v51 = vpop.f32.mrb[25].mxu1 }
 0x14f   :  { %v1344_v28 = vadd.f32 %v2495_v17, %v1330_v14  ;;  %v1252_v29 = vrot.slane %v861_v16, 1  ;;  %v1315_v30 = vrot.slane %v930_v18, 3  ;;  %v1284_v31 = vrot.slane %v863_v27, 2  ;;  %v934_v32 = vpop.f32.mrb[26].mxu1 }
 0x150   :  { %v1362_v33 = vmax.f32 %v1360_v23, %v1361_v21  ;;  %v1368_v1 = vrot.slane %v1367_v22, 2  ;;  %v1372_v36 = vsel %vm1357_vm6, %v1351_v25, -inf  ;;  %v1299_v37 = vadd.f32 %v1283_v58, %v1267_v26  ;;  %v2536_v38 = vpop.f32.mrb[27].mxu1 }
 0x151   :  { %v1373_v34 = vrot.slane %v1372_v36, 4  ;;  %v1352_v39 = vmax.f32 %v1344_v28, 0.0  ;;  %v1268_v44 = vadd.f32 %v1252_v29, %v2488_v55  ;;  %v2543_v46 = vsel %vm1641_vm9, %v1238_v19, %v1640_v20 }
 0x152   :  { %v1363_v41 = vrot.slane %v1362_v33, 1  ;;  %v1369_v42 = vmax.f32 %v1367_v22, %v1368_v1  ;;  %v1331_v43 = vadd.f32 %v1315_v30, %v1299_v37  ;;  %v1316_v50 = vrot.slane %v934_v32, 3 }
 0x153   :  { %v1374_v47 = vmax.f32 %v1372_v36, %v1373_v34  ;;  %v1379_v48 = vsel %vm1357_vm6, %v1352_v39, -inf  ;;  %v1300_v49 = vadd.f32 %v1284_v31, %v1268_v44  ;;  %v867_v52 = vpop.f32.mrb[28].mxu0 }
 0x154   :  { %v1364_v53 = vmax.f32 %v1362_v33, %v1363_v41  ;;  %v1370_v54 = vrot.slane %v1369_v42, 1  ;;  %v1380_v56 = vrot.slane %v1379_v48, 4  ;;  %v1345_v55 = vadd.f32 %v2495_v17, %v1331_v43  ;;  %v869_v59 = vpop.f32.mrb[29].mxu0 }
 0x155   :  { %v1375_v0 = vrot.slane %v1374_v47, 2  ;;  %v1332_v15 = vadd.f32 %v1316_v50, %v1300_v49  ;;  %v1253_v61 = vrot.slane %v867_v52, 1  ;;  %v1285_v62 = vrot.slane %v869_v59, 2  ;;  %v871_v63 = vpop.f32.mrb[30].mxu0  ;;  %v940_v2 = vpop.f32.mrb[28].mxu1 }
 0x156   :  { %v1371_v3 = vmax.f32 %v1369_v42, %v1370_v54  ;;  %v1381_v5 = vmax.f32 %v1379_v48, %v1380_v56  ;;  %v1353_v6 = vmax.f32 %v1345_v55, 0.0  ;;  %v1254_v7 = vrot.slane %v871_v63, 1  ;;  %v873_v8 = vpop.f32.mrb[31].mxu0  ;;  %v2547_v60 = vpop.f32.mrb[29].mxu1 }
 0x157   :  { %v1376_v23 = vmax.f32 %v1374_v47, %v1375_v0  ;;  %v1346_v9 = vadd.f32 %v2495_v17, %v1332_v15  ;;  %v1269_v10 = vadd.f32 %v1253_v61, %v2498_v24  ;;  %v1317_v11 = vrot.slane %v940_v2, 3  ;;  %v944_v12 = vpop.f32.mrb[30].mxu1 }
 0x158   :  { %v1382_v14 = vrot.slane %v1381_v5, 2  ;;  %v1386_v58 = vsel %vm1357_vm6, %v1353_v6, -inf  ;;  %v1270_v16 = vadd.f32 %v1254_v7, %v2501_v35  ;;  %v1286_v18 = vrot.slane %v873_v8, 2  ;;  %v2553_v19 = vpop.f32.mrb[31].mxu1 }
 0x159   :  { %v1377_v20 = vrot.slane %v1376_v23, 1  ;;  %v1387_v21 = vrot.slane %v1386_v58, 4  ;;  %v1354_v22 = vmax.f32 %v1346_v9, 0.0  ;;  %v1301_v25 = vadd.f32 %v1285_v62, %v1269_v10 }
 0x15a   :  { %v1383_v26 = vmax.f32 %v1381_v5, %v1382_v14  ;;  %v1302_v27 = vadd.f32 %v1286_v18, %v1270_v16  ;;  %v1318_v28 = vrot.slane %v944_v12, 3  ;;  %v1652_v29 = vsel %vm1629_vm2, %v1371_v3, %v1364_v53 }
 0x15b   :  { %v1378_v24 = vmax.f32 %v1376_v23, %v1377_v20  ;;  %v1388_v30 = vmax.f32 %v1386_v58, %v1387_v21  ;;  %v1393_v31 = vsel %vm1357_vm6, %v1354_v22, -inf  ;;  %v1333_v32 = vadd.f32 %v1317_v11, %v1301_v25  ;;  %v983_v33 = vpop.f32.mrb[32].mxu0 }
 0x15c   :  { %v1384_v1 = vrot.slane %v1383_v26, 1  ;;  %v1394_v35 = vrot.slane %v1393_v31, 4  ;;  %v1334_v36 = vadd.f32 %v1318_v28, %v1302_v27  ;;  %v1422_v37 = vrot.slane %v983_v33, 1  ;;  %v985_v34 = vpop.f32.mrb[33].mxu0 }
 0x15d   :  { %v1389_v39 = vrot.slane %v1388_v30, 2  ;;  %v1347_v44 = vadd.f32 %v2495_v17, %v1333_v32  ;;  %v1454_v41 = vrot.slane %v985_v34, 2  ;;  %v987_v42 = vpop.f32.mrb[34].mxu0  ;;  %v1056_v43 = vpop.f32.mrb[32].mxu1  ;;  %v2559_v47 = vsel %vm1631_vm3, %v1378_v24, %v1652_v29 }
 0x15e   :  { %v2561_v48 = vmax.f32 %v1383_v26, %v1384_v1  ;;  %v1395_v49 = vmax.f32 %v1393_v31, %v1394_v35  ;;  %v1348_v50 = vadd.f32 %v2495_v17, %v1334_v36  ;;  %v1438_v52 = vadd.f32 %v1422_v37, %v2508_v4  ;;  %v989_v53 = vpop.f32.mrb[35].mxu0  ;;  %v1058_v54 = vpop.f32.mrb[33].mxu1 }
 0x15f   :  { %v1390_v56 = vmax.f32 %v1388_v30, %v1389_v39  ;;  %v1355_v55 = vmax.f32 %v1347_v44, 0.0  ;;  %v1423_v59 = vrot.slane %v987_v42, 1  ;;  %v1486_v0 = vrot.slane %v1056_v43, 3  ;;  %v1060_v15 = vpop.f32.mrb[34].mxu1 }
 0x160   :  { %v1396_v61 = vrot.slane %v1395_v49, 2  ;;  %v1356_v62 = vmax.f32 %v1348_v50, 0.0  ;;  %v1470_v63 = vadd.f32 %v1454_v41, %v1438_v52  ;;  %v1455_v2 = vrot.slane %v989_v53, 2  ;;  %v1062_v3 = vpop.f32.mrb[35].mxu1 }
 0x161   :  { %v1391_v5 = vrot.slane %v1390_v56, 1  ;;  %v1400_v6 = vsel %vm1357_vm6, %v1355_v55, -inf  ;;  %v1439_v17 = vadd.f32 %v1423_v59, %v2511_v13  ;;  %v1518_v7 = vrot.slane %v1058_v54, 4 }
 0x162   :  { %v1397_v4 = vmax.f32 %v1395_v49, %v1396_v61  ;;  %v1401_v8 = vrot.slane %v1400_v6, 4  ;;  %v1407_v23 = vsel %vm1357_vm6, %v1356_v62, -inf  ;;  %v1502_v9 = vadd.f32 %v1486_v0, %v1470_v63 }
 0x163   :  { %v2568_v10 = vmax.f32 %v1390_v56, %v1391_v5  ;;  %v1408_v11 = vrot.slane %v1407_v23, 4  ;;  %v1471_v12 = vadd.f32 %v1455_v2, %v1439_v17  ;;  %v1487_v14 = vrot.slane %v1060_v15, 3  ;;  %v993_v58 = vpop.f32.mrb[36].mxu0 }
 0x164   :  { %v1398_v16 = vrot.slane %v1397_v4, 1  ;;  %v1402_v18 = vmax.f32 %v1400_v6, %v1401_v8  ;;  %v1534_v20 = vadd.f32 %v1518_v7, %v1502_v9  ;;  %v1519_v21 = vrot.slane %v1062_v3, 4  ;;  %v995_v22 = vpop.f32.mrb[37].mxu0 }
 0x165   :  { %v1409_v25 = vmax.f32 %v1407_v23, %v1408_v11  ;;  %v1503_v26 = vadd.f32 %v1487_v14, %v1471_v12  ;;  %v1424_v13 = vrot.slane %v993_v58, 1  ;;  %v1456_v27 = vrot.slane %v995_v22, 2  ;;  %v997_v28 = vpop.f32.mrb[38].mxu0  ;;  %v1066_v29 = vpop.f32.mrb[36].mxu1 }
 0x166   :  { %v1403_v24 = vrot.slane %v1402_v18, 2  ;;  %v1548_v30 = vadd.f32 %v2540_v40, %v1534_v20  ;;  %v1425_v31 = vrot.slane %v997_v28, 1  ;;  %v1488_v32 = vrot.slane %v1066_v29, 3  ;;  %v999_v33 = vpop.f32.mrb[39].mxu0  ;;  %v1068_v1 = vpop.f32.mrb[37].mxu1 }
 0x167   :  { %v1410_v35 = vrot.slane %v1409_v25, 2  ;;  %v1535_v36 = vadd.f32 %v1519_v21, %v1503_v26  ;;  %v1440_v37 = vadd.f32 %v1424_v13, %v2519_v45  ;;  %v1457_v34 = vrot.slane %v999_v33, 2  ;;  %v1070_v39 = vpop.f32.mrb[38].mxu1 }
 0x168   :  { %v1404_v44 = vmax.f32 %v1402_v18, %v1403_v24  ;;  %v1556_v41 = vmax.f32 %v1548_v30, 0.0  ;;  %v1441_v42 = vadd.f32 %v1425_v31, %v2523_v57  ;;  %v1520_v43 = vrot.slane %v1068_v1, 4  ;;  %v1072_v49 = vpop.f32.mrb[39].mxu1 }
 0x169   :  { %v1549_v50 = vadd.f32 %v2540_v40, %v1535_v36  ;;  %v1472_v52 = vadd.f32 %v1456_v27, %v1440_v37  ;;  %v1489_v53 = vrot.slane %v1070_v39, 3  ;;  %v1521_v54 = vrot.slane %v1072_v49, 4 }
 0x16a   :  { %v1565_v56 = vsel %vm1564_vm10, %v1556_v41, -inf  ;;  %v1473_v55 = vadd.f32 %v1457_v34, %v1441_v42  ;;  %v2575_v59 = vmax.f32 %v1397_v4, %v1398_v16  ;;  %v1405_v0 = vrot.slane %v1404_v44, 1 }
 0x16b   :  { %v1566_v45 = vrot.slane %v1565_v56, 4  ;;  %v1557_v15 = vmax.f32 %v1549_v50, 0.0  ;;  %v1504_v61 = vadd.f32 %v1488_v32, %v1472_v52  ;;  %v1003_v62 = vpop.f32.mrb[40].mxu0  ;;  %v1411_v63 = vmax.f32 %v1409_v25, %v1410_v35 }
 0x16c   :  { %v1505_v2 = vadd.f32 %v1489_v53, %v1473_v55  ;;  %v1426_v57 = vrot.slane %v1003_v62, 1  ;;  %v1005_v3 = vpop.f32.mrb[41].mxu0  ;;  %v2577_v5 = vmax.f32 %v1404_v44, %v1405_v0  ;;  %v1654_v6 = vsel %vm1633_vm4, %v2561_v48, %v2559_v47 }
 0x16d   :  { %v1567_v17 = vmax.f32 %v1565_v56, %v1566_v45  ;;  %v1572_v7 = vsel %vm1564_vm10, %v1557_v15, -inf  ;;  %v1536_v4 = vadd.f32 %v1520_v43, %v1504_v61  ;;  %v1458_v8 = vrot.slane %v1005_v3, 2  ;;  %v1007_v23 = vpop.f32.mrb[42].mxu0  ;;  %v1076_v9 = vpop.f32.mrb[40].mxu1 }
 0x16e   :  { %v1573_v11 = vrot.slane %v1572_v7, 4  ;;  %v1537_v12 = vadd.f32 %v1521_v54, %v1505_v2  ;;  %v1442_v14 = vadd.f32 %v1426_v57, %v2532_v51  ;;  %v1427_v58 = vrot.slane %v1007_v23, 1  ;;  %v1009_v16 = vpop.f32.mrb[43].mxu0  ;;  %v1078_v18 = vpop.f32.mrb[41].mxu1 }
 0x16f   :  { %v1568_v20 = vrot.slane %v1567_v17, 2  ;;  %v1550_v21 = vadd.f32 %v2540_v40, %v1536_v4  ;;  %v1490_v22 = vrot.slane %v1076_v9, 3  ;;  %v1459_v25 = vrot.slane %v1009_v16, 2  ;;  %v1080_v47 = vpop.f32.mrb[42].mxu1 }
 0x170   :  { %v1574_v48 = vmax.f32 %v1572_v7, %v1573_v11  ;;  %v1551_v26 = vadd.f32 %v2540_v40, %v1537_v12  ;;  %v1474_v13 = vadd.f32 %v1458_v8, %v1442_v14  ;;  %v1443_v27 = vadd.f32 %v1427_v58, %v2536_v38  ;;  %v1082_v28 = vpop.f32.mrb[43].mxu1 }
 0x171   :  { %v1569_v29 = vmax.f32 %v1567_v17, %v1568_v20  ;;  %v1558_v24 = vmax.f32 %v1550_v21, 0.0  ;;  %v1522_v30 = vrot.slane %v1078_v18, 4  ;;  %v1491_v51 = vrot.slane %v1080_v47, 3 }
 0x172   :  { %v1575_v31 = vrot.slane %v1574_v48, 2  ;;  %v1559_v32 = vmax.f32 %v1551_v26, 0.0  ;;  %v1506_v33 = vadd.f32 %v1490_v22, %v1474_v13  ;;  %v1475_v1 = vadd.f32 %v1459_v25, %v1443_v27 }
 0x173   :  { %v1570_v35 = vrot.slane %v1569_v29, 1  ;;  %v1579_v36 = vsel %vm1564_vm10, %v1558_v24, -inf  ;;  %v1523_v37 = vrot.slane %v1082_v28, 4  ;;  %v1412_v34 = vrot.slane %v1411_v63, 1  ;;  %v1013_v39 = vpop.f32.mrb[44].mxu0 }
 0x174   :  { %v1576_v44 = vmax.f32 %v1574_v48, %v1575_v31  ;;  %v1580_v41 = vrot.slane %v1579_v36, 4  ;;  %v1586_v42 = vsel %vm1564_vm10, %v1559_v32, -inf  ;;  %v1538_v38 = vadd.f32 %v1522_v30, %v1506_v33  ;;  %v1015_v43 = vpop.f32.mrb[45].mxu0 }
 0x175   :  { %v1571_v49 = vmax.f32 %v1569_v29, %v1570_v35  ;;  %v1587_v50 = vrot.slane %v1586_v42, 4  ;;  %v1507_v52 = vadd.f32 %v1491_v51, %v1475_v1  ;;  %v1413_v53 = vmax.f32 %v1411_v63, %v1412_v34  ;;  %v1017_v54 = vpop.f32.mrb[46].mxu0  ;;  %v1086_v56 = vpop.f32.mrb[44].mxu1 }
 0x176   :  { %v1577_v55 = vrot.slane %v1576_v44, 1  ;;  %v1581_v0 = vmax.f32 %v1579_v36, %v1580_v41  ;;  %v1552_v45 = vadd.f32 %v2540_v40, %v1538_v38  ;;  %v1655_v15 = vsel %vm1635_vm5, %v2568_v10, %v1654_v6  ;;  %v1019_v61 = vpop.f32.mrb[47].mxu0  ;;  %v1088_v62 = vpop.f32.mrb[45].mxu1 }
 0x177   :  { %v1588_v2 = vmax.f32 %v1586_v42, %v1587_v50  ;;  %v1539_v57 = vadd.f32 %v1523_v37, %v1507_v52  ;;  %v1656_v3 = vsel %vm1637_vm7, %v2575_v59, %v1655_v15  ;;  %v1428_v17 = vrot.slane %v1013_v39, 1  ;;  %v1090_v7 = vpop.f32.mrb[46].mxu1 }
 0x178   :  { %v1578_v4 = vmax.f32 %v1576_v44, %v1577_v55  ;;  %v1582_v63 = vrot.slane %v1581_v0, 2  ;;  %v1560_v8 = vmax.f32 %v1552_v45, 0.0  ;;  %v1657_v23 = vsel %vm1639_vm8, %v2577_v5, %v1656_v3  ;;  %v1092_v9 = vpop.f32.mrb[47].mxu1 }
 0x179   :  { %v1589_v11 = vrot.slane %v1588_v2, 2  ;;  %v1553_v12 = vadd.f32 %v2540_v40, %v1539_v57  ;;  %v1658_v10 = vsel %vm1641_vm9, %v1413_v53, %v1657_v23  ;;  %v1444_v6 = vadd.f32 %v1428_v17, %v2547_v60 }
 0x17a   :  { %v1668_v14 = vsel %vm1629_vm2, %v1578_v4, %v1571_v49  ;;  %v1583_v58 = vmax.f32 %v1581_v0, %v1582_v63  ;;  %v1593_v59 = vsel %vm1564_vm10, %v1560_v8, -inf  ;;  %1795 = vmatprep.mubr.f32.mxu0 %v1658_v10  ;;  %v1460_v16 = vrot.slane %v1015_v43, 2 }
 0x17b   :  { %v1590_v18 = vmax.f32 %v1588_v2, %v1589_v11  ;;  %v1594_v20 = vrot.slane %v1593_v59, 4  ;;  %v1561_v21 = vmax.f32 %v1553_v12, 0.0  ;;  %1796 = vmatmul.mubr.f32.vlgmr.msra.gmra.mrb[48].mxu0 %v2543_v46  ;;  %v1429_v5 = vrot.slane %v1017_v54, 1 }
 0x17c   :  { %v1584_v22 = vrot.slane %v1583_v58, 1  ;;  %v1476_v25 = vadd.f32 %v1460_v16, %v1444_v6  ;;  %v1492_v47 = vrot.slane %v1086_v56, 3  ;;  %v1461_v48 = vrot.slane %v1019_v61, 2  ;;  %v1978_v6 = vld [vmem:[%s2624_s4] ss:$0 sm:$0xff] }
 0x17d   :  { %v1591_v26 = vrot.slane %v1590_v18, 1  ;;  %v1595_v13 = vmax.f32 %v1593_v59, %v1594_v20  ;;  %v1600_v60 = vsel %vm1564_vm10, %v1561_v21, -inf  ;;  %v1445_v27 = vadd.f32 %v1429_v5, %v2553_v19 }
 0x17e   :  { %v1585_v28 = vmax.f32 %v1583_v58, %v1584_v22  ;;  %v1601_v29 = vrot.slane %v1600_v60, 4  ;;  %v1508_v24 = vadd.f32 %v1492_v47, %v1476_v25  ;;  %v1524_v30 = vrot.slane %v1088_v62, 4 }
 0x17f   :  { %v1592_v51 = vmax.f32 %v1590_v18, %v1591_v26  ;;  %v1596_v31 = vrot.slane %v1595_v13, 2  ;;  %v1477_v32 = vadd.f32 %v1461_v48, %v1445_v27  ;;  %v1493_v33 = vrot.slane %v1090_v7, 3 }
 0x180   :  { %v1602_v46 = vmax.f32 %v1600_v60, %v1601_v29  ;;  %v1540_v1 = vadd.f32 %v1524_v30, %v1508_v24  ;;  %v1669_v35 = vsel %vm1631_vm3, %v1585_v28, %v1668_v14  ;;  %v1525_v34 = vrot.slane %v1092_v9, 4 }
 0x181   :  { %v1597_v36 = vmax.f32 %v1595_v13, %v1596_v31  ;;  %v1509_v37 = vadd.f32 %v1493_v33, %v1477_v32  ;;  %v1670_v39 = vsel %vm1633_vm4, %v1592_v51, %v1669_v35 }
 0x182   :  { %v1603_v44 = vrot.slane %v1602_v46, 2  ;;  %v1554_v19 = vadd.f32 %v2540_v40, %v1540_v1 }
 0x183   :  { %v1598_v41 = vrot.slane %v1597_v36, 1  ;;  %v1541_v42 = vadd.f32 %v1525_v34, %v1509_v37 }
 0x184   :  { %v1604_v38 = vmax.f32 %v1602_v46, %v1603_v44  ;;  %v1562_v43 = vmax.f32 %v1554_v19, 0.0 }
 0x185   :  { %v1599_v49 = vmax.f32 %v1597_v36, %v1598_v41  ;;  %v1555_v50 = vadd.f32 %v2540_v40, %v1541_v42 }
 0x186   :  { %v1605_v52 = vrot.slane %v1604_v38, 1  ;;  %v1607_v53 = vsel %vm1564_vm10, %v1562_v43, -inf }
 0x187   :  { %v1608_v54 = vrot.slane %v1607_v53, 4  ;;  %v1563_v56 = vmax.f32 %v1555_v50, 0.0  ;;  %v1671_v55 = vsel %vm1635_vm5, %v1599_v49, %v1670_v39 }
 0x188   :  { %v1606_v0 = vmax.f32 %v1604_v38, %v1605_v52 }
 0x189   :  { %v1609_v45 = vmax.f32 %v1607_v53, %v1608_v54  ;;  %v1614_v15 = vsel %vm1564_vm10, %v1563_v56, -inf }
 0x18a   :  { %v1615_v61 = vrot.slane %v1614_v15, 4  ;;  %v1672_v62 = vsel %vm1637_vm7, %v1606_v0, %v1671_v55 }
 0x18b   :  { %v1610_v2 = vrot.slane %v1609_v45, 2 }
 0x18c   :  { %v1616_v57 = vmax.f32 %v1614_v15, %v1615_v61 }
 0x18d   :  { %v1611_v3 = vmax.f32 %v1609_v45, %v1610_v2 }
 0x18e   :  { %v1617_v17 = vrot.slane %v1616_v57, 2 }
 0x18f   :  { %v1612_v7 = vrot.slane %v1611_v3, 1 }
 0x190   :  { %v1618_v40 = vmax.f32 %v1616_v57, %v1617_v17 }
 0x191   :  { %v1613_v4 = vmax.f32 %v1611_v3, %v1612_v7 }
 0x192   :  { %v1619_v63 = vrot.slane %v1618_v40, 1 }
 0x193   :  { %v1673_v8 = vsel %vm1639_vm8, %v1613_v4, %v1672_v62 }
 0x194   :  { %v1620_v23 = vmax.f32 %v1618_v40, %v1619_v63 }
 0x196   :  { %v1674_v9 = vsel %vm1641_vm9, %v1620_v23, %v1673_v8 }
 0x197   :  { %2064 = vmatmul.mubr.f32.vlgmr.msra.gmra.mrb[48].mxu1 %v1674_v9 }
 0x24e   :  { %v2011_v11 = vpop.f32.mrb[48].mxu0 }
 0x24f   :  { %v2012_v12 = vpop.f32.mrb[49].mxu0 }
 0x250   :  { %v2013_v10 = vadd.f32 %v2012_v12, %v2011_v11 }
 0x252   :  { %v1798_v14 = vadd.f32 %v2013_v10, %v1978_v6 }
 0x26a   :  { %v1867_v58 = vpop.f32.mrb[48].mxu1 }
 0x26b   :  { %v1868_v59 = vadd.f32 %v1867_v58, %v1798_v14  ;;  %v2065_v16 = vpop.f32.mrb[49].mxu1 }
 0x26d   :  { %1871 = vst [vmem:[%s2625_s5] sm:$0xff] %v1868_v59 }
 0x26e   :  { %1876 = vsyncpa [#allocation3], 1 }
 0x26f   :  { %1877 = vsyncpa [#allocation5], 1 }

</bundles_post_ra>
